<compile_context>
chip_gen: v5e
topology: v5e:2x2
jax: 0.10.0
libtpu: 0.0.40
codegen_flags: <defaults>
</compile_context>

<pallas_src>
import functools

import jax
import jax.numpy as jnp
import numpy as np
from jax.experimental import pallas as pl
from jax.experimental.pallas import tpu as pltpu


VMEM_SPEC = pl.BlockSpec(memory_space=pltpu.MemorySpace.VMEM)


# ------------------------------ fused kernel --------------------------------


def value_kernel(x_ref, h_ref, mixw_ref, ef_ref,
                 wi_ref, wh_ref, bi_ref, bh_ref,
                 w1h_ref, w1p_ref, b1_ref, na_w1a_ref,
                 na_w2_ref, na_b2_ref, na_w3_ref, na_b3_ref, na_w4_ref, na_b4_ref,
                 at_w2_ref, at_b2_ref, at_w3_ref, at_b3_ref, at_w4_ref, at_b4_ref,
                 en_w1_ref, en_b1_ref, en_w2a_ref, en_b2a_ref,
                 h_out_ref, psi_ref,
                 na_scr, at_scr):
    B, H = h_ref.shape
    Hv = na_w2_ref.shape[0]
    n_a = na_w1a_ref.shape[0]
    n_tot = psi_ref.shape[1]
    n_e = n_tot - n_a

    f32 = jnp.float32

    x = x_ref[...]
    h_prev = h_ref[...]

    # ---------------- GRU cell (stacked gates, column order [r | z | n]) -----
    gi = jnp.dot(x, wi_ref[...], preferred_element_type=f32) + bi_ref[...]
    gh = jnp.dot(h_prev, wh_ref[...], preferred_element_type=f32) + bh_ref[...]
    r = jax.nn.sigmoid(gi[:, 0:H] + gh[:, 0:H])
    z = jax.nn.sigmoid(gi[:, H:2 * H] + gh[:, H:2 * H])
    n = jnp.tanh(gi[:, 2 * H:] + r * gh[:, 2 * H:])
    h_new = (1.0 - z) * n + z * h_prev
    h_out_ref[...] = h_new

    mixw = mixw_ref[...]

    # ---- layer-1 "traj" projections for BOTH heads, per batch row (B rows) --
    # stacked weights: columns [0:Hv] -> no-attack head, [Hv:2Hv] -> attack head
    tp = (jnp.dot(h_new, w1h_ref[...], preferred_element_type=f32)
          + jnp.dot(mixw, w1p_ref[...], preferred_element_type=f32)
          + b1_ref[...])                                          # (B, 2*Hv)
    tp_na = tp[:, 0:Hv]
    tp_at = tp[:, Hv:2 * Hv]

    # ------ enemy embedding fused with its attack layer-1 projection ---------
    ef = ef_ref[...]                                              # (B*n_e, obs_en)
    e1 = jnp.maximum(
        jnp.dot(ef, en_w1_ref[...], preferred_element_type=f32) + en_b1_ref[...],
        0.0)
    ep = (jnp.dot(e1, en_w2a_ref[...], preferred_element_type=f32)
          + en_b2a_ref[...])                                      # (B*n_e, Hv)

    # ---- build flattened layer-1 activations (b-major rows) in VMEM scratch -
    w1a = na_w1a_ref[...]                                         # (n_a, Hv)
    for b in range(B):
        na_scr[b * n_a:(b + 1) * n_a, :] = jnp.maximum(
            tp_na[b:b + 1, :] + w1a, 0.0)
        at_scr[b * n_e:(b + 1) * n_e, :] = jnp.maximum(
            ep[b * n_e:(b + 1) * n_e, :] + tp_at[b:b + 1, :], 0.0)

    # ---------------- no-attack psi head, layers 2-4 (B*n_a rows) ------------
    v = na_scr[...]
    v = jnp.maximum(
        jnp.dot(v, na_w2_ref[...], preferred_element_type=f32) + na_b2_ref[...], 0.0)
    v = jnp.maximum(
        jnp.dot(v, na_w3_ref[...], preferred_element_type=f32) + na_b3_ref[...], 0.0)
    wo = jnp.dot(v, na_w4_ref[...], preferred_element_type=f32) + na_b4_ref[...]

    # ---------------- attack psi head, layers 2-4 (B*n_e rows) ---------------
    v = at_scr[...]
    v = jnp.maximum(
        jnp.dot(v, at_w2_ref[...], preferred_element_type=f32) + at_b2_ref[...], 0.0)
    v = jnp.maximum(
        jnp.dot(v, at_w3_ref[...], preferred_element_type=f32) + at_b3_ref[...], 0.0)
    at = jnp.dot(v, at_w4_ref[...], preferred_element_type=f32) + at_b4_ref[...]

    # ---------------- write psi directly: (B, n_a + n_e, P) ------------------
    for b in range(B):
        psi_ref[b, 0:n_a, :] = wo[b * n_a:(b + 1) * n_a, :]
        psi_ref[b, n_a:n_tot, :] = at[b * n_e:(b + 1) * n_e, :]


# ------------------------------ parameters ----------------------------------


def _linear(key, fan_in, fan_out):
    k1, k2 = jax.random.split(key)
    bound = 1.0 / np.sqrt(fan_in)
    w = jax.random.uniform(k1, (fan_in, fan_out), jnp.float32, -bound, bound)
    b = jax.random.uniform(k2, (1, fan_out), jnp.float32, -bound, bound)
    return w, b


def init_params(key, din_attn, H, P, n_a, obs_en_dim, Hv):
    keys = jax.random.split(key, 16)
    ki = iter(keys)
    p = {}

    # GRUCell weights, stacked along the output axis in [r | z | n] order.
    bound = 1.0 / np.sqrt(H)
    p["w_i"] = jax.random.uniform(next(ki), (din_attn, 3 * H), jnp.float32, -bound, bound)
    p["w_h"] = jax.random.uniform(next(ki), (H, 3 * H), jnp.float32, -bound, bound)
    p["b_i"] = jax.random.uniform(next(ki), (1, 3 * H), jnp.float32, -bound, bound)
    p["b_h"] = jax.random.uniform(next(ki), (1, 3 * H), jnp.float32, -bound, bound)

    # no_attack_psi : FCNet(H + P + n_a -> P, hidden=Hv, 3 hidden layers)
    # layer-1 weight stored split over its input blocks [h | mixing_w | one-hot].
    w1, b1 = _linear(next(ki), H + P + n_a, Hv)
    p["na_w1h"], p["na_w1p"], p["na_w1a"] = w1[:H], w1[H:H + P], w1[H + P:]
    p["na_b1"] = b1
    p["na_w2"], p["na_b2"] = _linear(next(ki), Hv, Hv)
    p["na_w3"], p["na_b3"] = _linear(next(ki), Hv, Hv)
    p["na_w4"], p["na_b4"] = _linear(next(ki), Hv, P)

    # attack_psi : FCNet(2H + P -> P); layer-1 split over [enemy_emb | h | mixing_w].
    w1, b1 = _linear(next(ki), 2 * H + P, Hv)
    p["at_w1e"], p["at_w1h"], p["at_w1p"] = w1[:H], w1[H:2 * H], w1[2 * H:]
    p["at_b1"] = b1
    p["at_w2"], p["at_b2"] = _linear(next(ki), Hv, Hv)
    p["at_w3"], p["at_b3"] = _linear(next(ki), Hv, Hv)
    p["at_w4"], p["at_b4"] = _linear(next(ki), Hv, P)

    # enemy_embed : Linear(obs_en_dim, H) -> ReLU -> Linear(H, H)
    p["en_w1"], p["en_b1"] = _linear(next(ki), obs_en_dim, H)
    p["en_w2"], p["en_b2"] = _linear(next(ki), H, H)
    return p


# -------------------------------- forward -----------------------------------


def value_module_forward(params, attn_feature, enemy_feats, hidden_state, mixing_w):
    B = attn_feature.shape[0]
    H = params["w_h"].shape[0]
    P = mixing_w.shape[-1]
    n_a = params["na_w1a"].shape[0]
    n_e = enemy_feats.shape[1]
    Hv = params["na_b1"].shape[1]

    h_in = hidden_state.reshape(B, H)
    ef = enemy_feats.reshape(B * n_e, enemy_feats.shape[-1])

    # Per-model constant weight prep (constant-folded by XLA under jit):
    #   * stack both heads' traj layer-1 weights -> one matmul pair in-kernel.
    #   * fuse enemy_embed layer-2 into the attack head's layer-1 enemy block.
    w1h_both = jnp.concatenate([params["na_w1h"], params["at_w1h"]], axis=1)  # (H, 2Hv)
    w1p_both = jnp.concatenate([params["na_w1p"], params["at_w1p"]], axis=1)  # (P, 2Hv)
    b1_both = jnp.concatenate([params["na_b1"], params["at_b1"]], axis=1)     # (1, 2Hv)
    en_w2a = params["en_w2"] @ params["at_w1e"]                               # (H, Hv)
    en_b2a = params["en_b2"] @ params["at_w1e"]                               # (1, Hv)

    args = (attn_feature, h_in, mixing_w, ef,
            params["w_i"], params["w_h"], params["b_i"], params["b_h"],
            w1h_both, w1p_both, b1_both, params["na_w1a"],
            params["na_w2"], params["na_b2"], params["na_w3"], params["na_b3"],
            params["na_w4"], params["na_b4"],
            params["at_w2"], params["at_b2"], params["at_w3"], params["at_b3"],
            params["at_w4"], params["at_b4"],
            params["en_w1"], params["en_b1"], en_w2a, en_b2a)

    h, psi = pl.pallas_call(
        value_kernel,
        out_shape=(jax.ShapeDtypeStruct((B, H), jnp.float32),
                   jax.ShapeDtypeStruct((B, n_a + n_e, P), jnp.float32)),
        in_specs=[VMEM_SPEC] * len(args),
        out_specs=(VMEM_SPEC, VMEM_SPEC),
        scratch_shapes=[pltpu.VMEM((B * n_a, Hv), jnp.float32),
                        pltpu.VMEM((B * n_e, Hv), jnp.float32)],
        input_output_aliases={1: 0},   # recurrent hidden state aliases the h output
    )(*args)
    return h, psi


# --------------------------- pure-JAX reference ------------------------------


def reference_forward(params, attn_feature, enemy_feats, hidden_state, mixing_w):
    B = attn_feature.shape[0]
    H = params["w_h"].shape[0]
    P = mixing_w.shape[-1]
    n_a = params["na_w1a"].shape[0]
    n_e = enemy_feats.shape[1]

    h_in = hidden_state.reshape(-1, H)
    gi = attn_feature @ params["w_i"] + params["b_i"]
    gh = h_in @ params["w_h"] + params["b_h"]
    r = jax.nn.sigmoid(gi[:, :H] + gh[:, :H])
    z = jax.nn.sigmoid(gi[:, H:2 * H] + gh[:, H:2 * H])
    n = jnp.tanh(gi[:, 2 * H:] + r * gh[:, 2 * H:])
    h = (1.0 - z) * n + z * h_in

    traj = jnp.concatenate([h, mixing_w], axis=-1)                  # (B, H+P)

    # no-attack head: reconstruct the original full layer-1 weight.
    na_w1 = jnp.concatenate(
        [params["na_w1h"], params["na_w1p"], params["na_w1a"]], axis=0)
    eye = jnp.eye(n_a, dtype=jnp.float32)
    psi_in = jnp.concatenate(
        [jnp.broadcast_to(traj[:, None, :], (B, n_a, H + P)),
         jnp.broadcast_to(eye[None, :, :], (B, n_a, n_a))], axis=-1)
    v = psi_in.reshape(B * n_a, -1)
    v = jnp.maximum(v @ na_w1 + params["na_b1"], 0.0)
    v = jnp.maximum(v @ params["na_w2"] + params["na_b2"], 0.0)
    v = jnp.maximum(v @ params["na_w3"] + params["na_b3"], 0.0)
    wo = (v @ params["na_w4"] + params["na_b4"]).reshape(B, n_a, P)

    ef = enemy_feats.reshape(B * n_e, -1)
    e1 = jnp.maximum(ef @ params["en_w1"] + params["en_b1"], 0.0)
    emb = (e1 @ params["en_w2"] + params["en_b2"]).reshape(B, n_e, H)
    at_w1 = jnp.concatenate(
        [params["at_w1e"], params["at_w1h"], params["at_w1p"]], axis=0)
    atk_in = jnp.concatenate(
        [emb, jnp.broadcast_to(traj[:, None, :], (B, n_e, H + P))], axis=-1)
    v = atk_in.reshape(B * n_e, -1)
    v = jnp.maximum(v @ at_w1 + params["at_b1"], 0.0)
    v = jnp.maximum(v @ params["at_w2"] + params["at_b2"], 0.0)
    v = jnp.maximum(v @ params["at_w3"] + params["at_b3"], 0.0)
    atk = (v @ params["at_w4"] + params["at_b4"]).reshape(B, n_e, P)

    return h, jnp.concatenate([wo, atk], axis=1)


# ---------------------------------- main -------------------------------------


if __name__ == "__main__":
    # Config consistent with the module (sc2 branch):
    #   entity_embed_dim=16, head=2  -> attn_feature dim = 32
    #   rnn_hidden_dim = 32, phi_dim = 16
    #   n_actions_no_attack = 6, n_enemies = 5
    #   obs_en_dim = aligned_obs_nf_en + 1 = 12, value_hidden_dim = 128
    B, E_DIM, HEAD = 8, 16, 2
    H, P = 32, 16
    N_A, N_E, OBS_EN = 6, 5, 12
    HV = 128
    DIN = E_DIM * HEAD

    key = jax.random.PRNGKey(0)
    k_param, k_x, k_e, k_h, k_w = jax.random.split(key, 5)
    params = init_params(k_param, DIN, H, P, N_A, OBS_EN, HV)

    attn_feature = jax.random.normal(k_x, (B, DIN), jnp.float32)
    enemy_feats = jax.random.normal(k_e, (B, N_E, OBS_EN), jnp.float32)
    hidden_state = jax.random.normal(k_h, (B, 1, H), jnp.float32)
    mixing_w = jax.random.normal(k_w, (B, P), jnp.float32)

    fwd = jax.jit(functools.partial(value_module_forward, params))
    h, psi = fwd(attn_feature, enemy_feats, hidden_state, mixing_w)
    jax.block_until_ready((h, psi))

    h_ref, psi_ref = reference_forward(
        params, attn_feature, enemy_feats, hidden_state, mixing_w)

    assert h.shape == (B, H), h.shape
    assert psi.shape == (B, N_A + N_E, P), psi.shape
    np.testing.assert_allclose(np.asarray(h), np.asarray(h_ref), rtol=1e-2, atol=1e-2)
    np.testing.assert_allclose(np.asarray(psi), np.asarray(psi_ref), rtol=1e-2, atol=1e-2)

    print("KERNEL_OK")
</pallas_src>

<mosaic_0001>
module attributes {stable_mosaic.version = 11 : i64} {
  func.func @value_kernel(%arg0: memref<8x32xf32, #tpu.memory_space<vmem>>, %arg1: memref<8x32xf32, #tpu.memory_space<vmem>>, %arg2: memref<8x16xf32, #tpu.memory_space<vmem>>, %arg3: memref<40x12xf32, #tpu.memory_space<vmem>>, %arg4: memref<32x96xf32, #tpu.memory_space<vmem>>, %arg5: memref<32x96xf32, #tpu.memory_space<vmem>>, %arg6: memref<1x96xf32, #tpu.memory_space<vmem>>, %arg7: memref<1x96xf32, #tpu.memory_space<vmem>>, %arg8: memref<32x256xf32, #tpu.memory_space<vmem>>, %arg9: memref<16x256xf32, #tpu.memory_space<vmem>>, %arg10: memref<1x256xf32, #tpu.memory_space<vmem>>, %arg11: memref<6x128xf32, #tpu.memory_space<vmem>>, %arg12: memref<128x128xf32, #tpu.memory_space<vmem>>, %arg13: memref<1x128xf32, #tpu.memory_space<vmem>>, %arg14: memref<128x128xf32, #tpu.memory_space<vmem>>, %arg15: memref<1x128xf32, #tpu.memory_space<vmem>>, %arg16: memref<128x16xf32, #tpu.memory_space<vmem>>, %arg17: memref<1x16xf32, #tpu.memory_space<vmem>>, %arg18: memref<128x128xf32, #tpu.memory_space<vmem>>, %arg19: memref<1x128xf32, #tpu.memory_space<vmem>>, %arg20: memref<128x128xf32, #tpu.memory_space<vmem>>, %arg21: memref<1x128xf32, #tpu.memory_space<vmem>>, %arg22: memref<128x16xf32, #tpu.memory_space<vmem>>, %arg23: memref<1x16xf32, #tpu.memory_space<vmem>>, %arg24: memref<12x32xf32, #tpu.memory_space<vmem>>, %arg25: memref<1x32xf32, #tpu.memory_space<vmem>>, %arg26: memref<32x128xf32, #tpu.memory_space<vmem>>, %arg27: memref<1x128xf32, #tpu.memory_space<vmem>>, %arg28: memref<8x32xf32, #tpu.memory_space<vmem>>, %arg29: memref<8x11x16xf32, #tpu.memory_space<vmem>>, %arg30: memref<48x128xf32, #tpu.memory_space<vmem>>, %arg31: memref<40x128xf32, #tpu.memory_space<vmem>>) attributes {dimension_semantics = [], scalar_prefetch = 0 : i64, scratch_operands = 2 : i64, tpu.core_type = #tpu.core_type<tc>} {
    %c0 = arith.constant 0 : index
    %c0_0 = arith.constant 0 : index
    %0 = vector.load %arg0[%c0, %c0_0] : memref<8x32xf32, #tpu.memory_space<vmem>>, vector<8x32xf32>
    %c0_1 = arith.constant 0 : index
    %c0_2 = arith.constant 0 : index
    %1 = vector.load %arg1[%c0_1, %c0_2] : memref<8x32xf32, #tpu.memory_space<vmem>>, vector<8x32xf32>
    %c0_3 = arith.constant 0 : index
    %c0_4 = arith.constant 0 : index
    %2 = vector.load %arg4[%c0_3, %c0_4] : memref<32x96xf32, #tpu.memory_space<vmem>>, vector<32x96xf32>
    %cst = arith.constant dense<0.000000e+00> : vector<8x96xf32>
    %3 = tpu.matmul %0, %2, %cst {dimension_numbers = #tpu.dot_dimension_numbers<[1], [0], [0], [1], [0, 0, 1, 1], [], []>} : vector<8x32xf32>, vector<32x96xf32>, vector<8x96xf32> -> vector<8x96xf32>
    %c0_5 = arith.constant 0 : index
    %c0_6 = arith.constant 0 : index
    %4 = vector.load %arg6[%c0_5, %c0_6] : memref<1x96xf32, #tpu.memory_space<vmem>>, vector<1x96xf32>
    %5 = vector.broadcast %4 : vector<1x96xf32> to vector<8x96xf32>
    %6 = arith.addf %3, %5 : vector<8x96xf32>
    %c0_7 = arith.constant 0 : index
    %c0_8 = arith.constant 0 : index
    %7 = vector.load %arg5[%c0_7, %c0_8] : memref<32x96xf32, #tpu.memory_space<vmem>>, vector<32x96xf32>
    %cst_9 = arith.constant dense<0.000000e+00> : vector<8x96xf32>
    %8 = tpu.matmul %1, %7, %cst_9 {dimension_numbers = #tpu.dot_dimension_numbers<[1], [0], [0], [1], [0, 0, 1, 1], [], []>} : vector<8x32xf32>, vector<32x96xf32>, vector<8x96xf32> -> vector<8x96xf32>
    %c0_10 = arith.constant 0 : index
    %c0_11 = arith.constant 0 : index
    %9 = vector.load %arg7[%c0_10, %c0_11] : memref<1x96xf32, #tpu.memory_space<vmem>>, vector<1x96xf32>
    %10 = vector.broadcast %9 : vector<1x96xf32> to vector<8x96xf32>
    %11 = arith.addf %8, %10 : vector<8x96xf32>
    %12 = vector.extract_strided_slice %6 {offsets = [0, 0], sizes = [8, 32], strides = [1, 1]} : vector<8x96xf32> to vector<8x32xf32>
    %13 = vector.extract_strided_slice %11 {offsets = [0, 0], sizes = [8, 32], strides = [1, 1]} : vector<8x96xf32> to vector<8x32xf32>
    %14 = arith.addf %12, %13 : vector<8x32xf32>
    %15 = arith.negf %14 : vector<8x32xf32>
    %16 = math.exp %15 : vector<8x32xf32>
    %cst_12 = arith.constant 1.000000e+00 : f32
    %17 = vector.broadcast %cst_12 : f32 to vector<8x32xf32>
    %18 = arith.addf %17, %16 : vector<8x32xf32>
    %19 = arith.divf %17, %18 : vector<8x32xf32>
    %20 = vector.extract_strided_slice %6 {offsets = [0, 32], sizes = [8, 32], strides = [1, 1]} : vector<8x96xf32> to vector<8x32xf32>
    %21 = vector.extract_strided_slice %11 {offsets = [0, 32], sizes = [8, 32], strides = [1, 1]} : vector<8x96xf32> to vector<8x32xf32>
    %22 = arith.addf %20, %21 : vector<8x32xf32>
    %23 = arith.negf %22 : vector<8x32xf32>
    %24 = math.exp %23 : vector<8x32xf32>
    %cst_13 = arith.constant 1.000000e+00 : f32
    %25 = vector.broadcast %cst_13 : f32 to vector<8x32xf32>
    %26 = arith.addf %25, %24 : vector<8x32xf32>
    %27 = arith.divf %25, %26 : vector<8x32xf32>
    %28 = vector.extract_strided_slice %6 {offsets = [0, 64], sizes = [8, 32], strides = [1, 1]} : vector<8x96xf32> to vector<8x32xf32>
    %29 = vector.extract_strided_slice %11 {offsets = [0, 64], sizes = [8, 32], strides = [1, 1]} : vector<8x96xf32> to vector<8x32xf32>
    %30 = arith.mulf %19, %29 : vector<8x32xf32>
    %31 = arith.addf %28, %30 : vector<8x32xf32>
    %32 = math.tanh %31 : vector<8x32xf32>
    %cst_14 = arith.constant 1.000000e+00 : f32
    %33 = vector.broadcast %cst_14 : f32 to vector<8x32xf32>
    %34 = arith.subf %33, %27 : vector<8x32xf32>
    %35 = arith.mulf %34, %32 : vector<8x32xf32>
    %36 = arith.mulf %27, %1 : vector<8x32xf32>
    %37 = arith.addf %35, %36 : vector<8x32xf32>
    %c0_15 = arith.constant 0 : index
    %c0_16 = arith.constant 0 : index
    %38 = vector.load %arg28[%c0_15, %c0_16] : memref<8x32xf32, #tpu.memory_space<vmem>>, vector<8x32xf32>
    tpu.vector_store %arg28[%c0_15, %c0_16], %37 {strides = array<i32>} : memref<8x32xf32, #tpu.memory_space<vmem>>, vector<8x32xf32>,
    %c0_17 = arith.constant 0 : index
    %c0_18 = arith.constant 0 : index
    %39 = vector.load %arg2[%c0_17, %c0_18] : memref<8x16xf32, #tpu.memory_space<vmem>>, vector<8x16xf32>
    %c0_19 = arith.constant 0 : index
    %c0_20 = arith.constant 0 : index
    %40 = vector.load %arg8[%c0_19, %c0_20] : memref<32x256xf32, #tpu.memory_space<vmem>>, vector<32x256xf32>
    %cst_21 = arith.constant dense<0.000000e+00> : vector<8x256xf32>
    %41 = tpu.matmul %37, %40, %cst_21 {dimension_numbers = #tpu.dot_dimension_numbers<[1], [0], [0], [1], [0, 0, 1, 1], [], []>} : vector<8x32xf32>, vector<32x256xf32>, vector<8x256xf32> -> vector<8x256xf32>
    %c0_22 = arith.constant 0 : index
    %c0_23 = arith.constant 0 : index
    %42 = vector.load %arg9[%c0_22, %c0_23] : memref<16x256xf32, #tpu.memory_space<vmem>>, vector<16x256xf32>
    %cst_24 = arith.constant dense<0.000000e+00> : vector<8x256xf32>
    %43 = tpu.matmul %39, %42, %cst_24 {dimension_numbers = #tpu.dot_dimension_numbers<[1], [0], [0], [1], [0, 0, 1, 1], [], []>} : vector<8x16xf32>, vector<16x256xf32>, vector<8x256xf32> -> vector<8x256xf32>
    %44 = arith.addf %41, %43 : vector<8x256xf32>
    %c0_25 = arith.constant 0 : index
    %c0_26 = arith.constant 0 : index
    %45 = vector.load %arg10[%c0_25, %c0_26] : memref<1x256xf32, #tpu.memory_space<vmem>>, vector<1x256xf32>
    %46 = vector.broadcast %45 : vector<1x256xf32> to vector<8x256xf32>
    %47 = arith.addf %44, %46 : vector<8x256xf32>
    %48 = vector.extract_strided_slice %47 {offsets = [0, 0], sizes = [8, 128], strides = [1, 1]} : vector<8x256xf32> to vector<8x128xf32>
    %49 = vector.extract_strided_slice %47 {offsets = [0, 128], sizes = [8, 128], strides = [1, 1]} : vector<8x256xf32> to vector<8x128xf32>
    %c0_27 = arith.constant 0 : index
    %c0_28 = arith.constant 0 : index
    %50 = vector.load %arg3[%c0_27, %c0_28] : memref<40x12xf32, #tpu.memory_space<vmem>>, vector<40x12xf32>
    %c0_29 = arith.constant 0 : index
    %c0_30 = arith.constant 0 : index
    %51 = vector.load %arg24[%c0_29, %c0_30] : memref<12x32xf32, #tpu.memory_space<vmem>>, vector<12x32xf32>
    %cst_31 = arith.constant dense<0.000000e+00> : vector<40x32xf32>
    %52 = tpu.matmul %50, %51, %cst_31 {dimension_numbers = #tpu.dot_dimension_numbers<[1], [0], [0], [1], [0, 0, 1, 1], [], []>} : vector<40x12xf32>, vector<12x32xf32>, vector<40x32xf32> -> vector<40x32xf32>
    %c0_32 = arith.constant 0 : index
    %c0_33 = arith.constant 0 : index
    %53 = vector.load %arg25[%c0_32, %c0_33] : memref<1x32xf32, #tpu.memory_space<vmem>>, vector<1x32xf32>
    %54 = vector.broadcast %53 : vector<1x32xf32> to vector<40x32xf32>
    %55 = arith.addf %52, %54 : vector<40x32xf32>
    %cst_34 = arith.constant 0.000000e+00 : f32
    %56 = vector.broadcast %cst_34 : f32 to vector<40x32xf32>
    %57 = arith.maximumf %55, %56 : vector<40x32xf32>
    %c0_35 = arith.constant 0 : index
    %c0_36 = arith.constant 0 : index
    %58 = vector.load %arg26[%c0_35, %c0_36] : memref<32x128xf32, #tpu.memory_space<vmem>>, vector<32x128xf32>
    %cst_37 = arith.constant dense<0.000000e+00> : vector<40x128xf32>
    %59 = tpu.matmul %57, %58, %cst_37 {dimension_numbers = #tpu.dot_dimension_numbers<[1], [0], [0], [1], [0, 0, 1, 1], [], []>} : vector<40x32xf32>, vector<32x128xf32>, vector<40x128xf32> -> vector<40x128xf32>
    %c0_38 = arith.constant 0 : index
    %c0_39 = arith.constant 0 : index
    %60 = vector.load %arg27[%c0_38, %c0_39] : memref<1x128xf32, #tpu.memory_space<vmem>>, vector<1x128xf32>
    %61 = vector.broadcast %60 : vector<1x128xf32> to vector<40x128xf32>
    %62 = arith.addf %59, %61 : vector<40x128xf32>
    %c0_40 = arith.constant 0 : index
    %c0_41 = arith.constant 0 : index
    %63 = vector.load %arg11[%c0_40, %c0_41] : memref<6x128xf32, #tpu.memory_space<vmem>>, vector<6x128xf32>
    %64 = vector.extract_strided_slice %48 {offsets = [0, 0], sizes = [1, 128], strides = [1, 1]} : vector<8x128xf32> to vector<1x128xf32>
    %65 = vector.broadcast %64 : vector<1x128xf32> to vector<6x128xf32>
    %66 = arith.addf %65, %63 : vector<6x128xf32>
    %cst_42 = arith.constant 0.000000e+00 : f32
    %67 = vector.broadcast %cst_42 : f32 to vector<6x128xf32>
    %68 = arith.maximumf %66, %67 : vector<6x128xf32>
    %c0_43 = arith.constant 0 : index
    %c0_44 = arith.constant 0 : index
    %69 = vector.load %arg30[%c0_43, %c0_44] : memref<48x128xf32, #tpu.memory_space<vmem>>, vector<6x128xf32>
    tpu.vector_store %arg30[%c0_43, %c0_44], %68 {strides = array<i32>} : memref<48x128xf32, #tpu.memory_space<vmem>>, vector<6x128xf32>,
    %70 = vector.extract_strided_slice %62 {offsets = [0, 0], sizes = [5, 128], strides = [1, 1]} : vector<40x128xf32> to vector<5x128xf32>
    %71 = vector.extract_strided_slice %49 {offsets = [0, 0], sizes = [1, 128], strides = [1, 1]} : vector<8x128xf32> to vector<1x128xf32>
    %72 = vector.broadcast %71 : vector<1x128xf32> to vector<5x128xf32>
    %73 = arith.addf %70, %72 : vector<5x128xf32>
    %cst_45 = arith.constant 0.000000e+00 : f32
    %74 = vector.broadcast %cst_45 : f32 to vector<5x128xf32>
    %75 = arith.maximumf %73, %74 : vector<5x128xf32>
    %c0_46 = arith.constant 0 : index
    %c0_47 = arith.constant 0 : index
    %76 = vector.load %arg31[%c0_46, %c0_47] : memref<40x128xf32, #tpu.memory_space<vmem>>, vector<5x128xf32>
    tpu.vector_store %arg31[%c0_46, %c0_47], %75 {strides = array<i32>} : memref<40x128xf32, #tpu.memory_space<vmem>>, vector<5x128xf32>,
    %77 = vector.extract_strided_slice %48 {offsets = [1, 0], sizes = [1, 128], strides = [1, 1]} : vector<8x128xf32> to vector<1x128xf32>
    %78 = vector.broadcast %77 : vector<1x128xf32> to vector<6x128xf32>
    %79 = arith.addf %78, %63 : vector<6x128xf32>
    %cst_48 = arith.constant 0.000000e+00 : f32
    %80 = vector.broadcast %cst_48 : f32 to vector<6x128xf32>
    %81 = arith.maximumf %79, %80 : vector<6x128xf32>
    %c6 = arith.constant 6 : index
    %c0_49 = arith.constant 0 : index
    %82 = vector.load %arg30[%c6, %c0_49] : memref<48x128xf32, #tpu.memory_space<vmem>>, vector<6x128xf32>
    tpu.vector_store %arg30[%c6, %c0_49], %81 {strides = array<i32>} : memref<48x128xf32, #tpu.memory_space<vmem>>, vector<6x128xf32>,
    %83 = vector.extract_strided_slice %62 {offsets = [5, 0], sizes = [5, 128], strides = [1, 1]} : vector<40x128xf32> to vector<5x128xf32>
    %84 = vector.extract_strided_slice %49 {offsets = [1, 0], sizes = [1, 128], strides = [1, 1]} : vector<8x128xf32> to vector<1x128xf32>
    %85 = vector.broadcast %84 : vector<1x128xf32> to vector<5x128xf32>
    %86 = arith.addf %83, %85 : vector<5x128xf32>
    %cst_50 = arith.constant 0.000000e+00 : f32
    %87 = vector.broadcast %cst_50 : f32 to vector<5x128xf32>
    %88 = arith.maximumf %86, %87 : vector<5x128xf32>
    %c5 = arith.constant 5 : index
    %c0_51 = arith.constant 0 : index
    %89 = vector.load %arg31[%c5, %c0_51] : memref<40x128xf32, #tpu.memory_space<vmem>>, vector<5x128xf32>
    tpu.vector_store %arg31[%c5, %c0_51], %88 {strides = array<i32>} : memref<40x128xf32, #tpu.memory_space<vmem>>, vector<5x128xf32>,
    %90 = vector.extract_strided_slice %48 {offsets = [2, 0], sizes = [1, 128], strides = [1, 1]} : vector<8x128xf32> to vector<1x128xf32>
    %91 = vector.broadcast %90 : vector<1x128xf32> to vector<6x128xf32>
    %92 = arith.addf %91, %63 : vector<6x128xf32>
    %cst_52 = arith.constant 0.000000e+00 : f32
    %93 = vector.broadcast %cst_52 : f32 to vector<6x128xf32>
    %94 = arith.maximumf %92, %93 : vector<6x128xf32>
    %c12 = arith.constant 12 : index
    %c0_53 = arith.constant 0 : index
    %95 = vector.load %arg30[%c12, %c0_53] : memref<48x128xf32, #tpu.memory_space<vmem>>, vector<6x128xf32>
    tpu.vector_store %arg30[%c12, %c0_53], %94 {strides = array<i32>} : memref<48x128xf32, #tpu.memory_space<vmem>>, vector<6x128xf32>,
    %96 = vector.extract_strided_slice %62 {offsets = [10, 0], sizes = [5, 128], strides = [1, 1]} : vector<40x128xf32> to vector<5x128xf32>
    %97 = vector.extract_strided_slice %49 {offsets = [2, 0], sizes = [1, 128], strides = [1, 1]} : vector<8x128xf32> to vector<1x128xf32>
    %98 = vector.broadcast %97 : vector<1x128xf32> to vector<5x128xf32>
    %99 = arith.addf %96, %98 : vector<5x128xf32>
    %cst_54 = arith.constant 0.000000e+00 : f32
    %100 = vector.broadcast %cst_54 : f32 to vector<5x128xf32>
    %101 = arith.maximumf %99, %100 : vector<5x128xf32>
    %c10 = arith.constant 10 : index
    %c0_55 = arith.constant 0 : index
    %102 = vector.load %arg31[%c10, %c0_55] : memref<40x128xf32, #tpu.memory_space<vmem>>, vector<5x128xf32>
    tpu.vector_store %arg31[%c10, %c0_55], %101 {strides = array<i32>} : memref<40x128xf32, #tpu.memory_space<vmem>>, vector<5x128xf32>,
    %103 = vector.extract_strided_slice %48 {offsets = [3, 0], sizes = [1, 128], strides = [1, 1]} : vector<8x128xf32> to vector<1x128xf32>
    %104 = vector.broadcast %103 : vector<1x128xf32> to vector<6x128xf32>
    %105 = arith.addf %104, %63 : vector<6x128xf32>
    %cst_56 = arith.constant 0.000000e+00 : f32
    %106 = vector.broadcast %cst_56 : f32 to vector<6x128xf32>
    %107 = arith.maximumf %105, %106 : vector<6x128xf32>
    %c18 = arith.constant 18 : index
    %c0_57 = arith.constant 0 : index
    %108 = vector.load %arg30[%c18, %c0_57] : memref<48x128xf32, #tpu.memory_space<vmem>>, vector<6x128xf32>
    tpu.vector_store %arg30[%c18, %c0_57], %107 {strides = array<i32>} : memref<48x128xf32, #tpu.memory_space<vmem>>, vector<6x128xf32>,
    %109 = vector.extract_strided_slice %62 {offsets = [15, 0], sizes = [5, 128], strides = [1, 1]} : vector<40x128xf32> to vector<5x128xf32>
    %110 = vector.extract_strided_slice %49 {offsets = [3, 0], sizes = [1, 128], strides = [1, 1]} : vector<8x128xf32> to vector<1x128xf32>
    %111 = vector.broadcast %110 : vector<1x128xf32> to vector<5x128xf32>
    %112 = arith.addf %109, %111 : vector<5x128xf32>
    %cst_58 = arith.constant 0.000000e+00 : f32
    %113 = vector.broadcast %cst_58 : f32 to vector<5x128xf32>
    %114 = arith.maximumf %112, %113 : vector<5x128xf32>
    %c15 = arith.constant 15 : index
    %c0_59 = arith.constant 0 : index
    %115 = vector.load %arg31[%c15, %c0_59] : memref<40x128xf32, #tpu.memory_space<vmem>>, vector<5x128xf32>
    tpu.vector_store %arg31[%c15, %c0_59], %114 {strides = array<i32>} : memref<40x128xf32, #tpu.memory_space<vmem>>, vector<5x128xf32>,
    %116 = vector.extract_strided_slice %48 {offsets = [4, 0], sizes = [1, 128], strides = [1, 1]} : vector<8x128xf32> to vector<1x128xf32>
    %117 = vector.broadcast %116 : vector<1x128xf32> to vector<6x128xf32>
    %118 = arith.addf %117, %63 : vector<6x128xf32>
    %cst_60 = arith.constant 0.000000e+00 : f32
    %119 = vector.broadcast %cst_60 : f32 to vector<6x128xf32>
    %120 = arith.maximumf %118, %119 : vector<6x128xf32>
    %c24 = arith.constant 24 : index
    %c0_61 = arith.constant 0 : index
    %121 = vector.load %arg30[%c24, %c0_61] : memref<48x128xf32, #tpu.memory_space<vmem>>, vector<6x128xf32>
    tpu.vector_store %arg30[%c24, %c0_61], %120 {strides = array<i32>} : memref<48x128xf32, #tpu.memory_space<vmem>>, vector<6x128xf32>,
    %122 = vector.extract_strided_slice %62 {offsets = [20, 0], sizes = [5, 128], strides = [1, 1]} : vector<40x128xf32> to vector<5x128xf32>
    %123 = vector.extract_strided_slice %49 {offsets = [4, 0], sizes = [1, 128], strides = [1, 1]} : vector<8x128xf32> to vector<1x128xf32>
    %124 = vector.broadcast %123 : vector<1x128xf32> to vector<5x128xf32>
    %125 = arith.addf %122, %124 : vector<5x128xf32>
    %cst_62 = arith.constant 0.000000e+00 : f32
    %126 = vector.broadcast %cst_62 : f32 to vector<5x128xf32>
    %127 = arith.maximumf %125, %126 : vector<5x128xf32>
    %c20 = arith.constant 20 : index
    %c0_63 = arith.constant 0 : index
    %128 = vector.load %arg31[%c20, %c0_63] : memref<40x128xf32, #tpu.memory_space<vmem>>, vector<5x128xf32>
    tpu.vector_store %arg31[%c20, %c0_63], %127 {strides = array<i32>} : memref<40x128xf32, #tpu.memory_space<vmem>>, vector<5x128xf32>,
    %129 = vector.extract_strided_slice %48 {offsets = [5, 0], sizes = [1, 128], strides = [1, 1]} : vector<8x128xf32> to vector<1x128xf32>
    %130 = vector.broadcast %129 : vector<1x128xf32> to vector<6x128xf32>
    %131 = arith.addf %130, %63 : vector<6x128xf32>
    %cst_64 = arith.constant 0.000000e+00 : f32
    %132 = vector.broadcast %cst_64 : f32 to vector<6x128xf32>
    %133 = arith.maximumf %131, %132 : vector<6x128xf32>
    %c30 = arith.constant 30 : index
    %c0_65 = arith.constant 0 : index
    %134 = vector.load %arg30[%c30, %c0_65] : memref<48x128xf32, #tpu.memory_space<vmem>>, vector<6x128xf32>
    tpu.vector_store %arg30[%c30, %c0_65], %133 {strides = array<i32>} : memref<48x128xf32, #tpu.memory_space<vmem>>, vector<6x128xf32>,
    %135 = vector.extract_strided_slice %62 {offsets = [25, 0], sizes = [5, 128], strides = [1, 1]} : vector<40x128xf32> to vector<5x128xf32>
    %136 = vector.extract_strided_slice %49 {offsets = [5, 0], sizes = [1, 128], strides = [1, 1]} : vector<8x128xf32> to vector<1x128xf32>
    %137 = vector.broadcast %136 : vector<1x128xf32> to vector<5x128xf32>
    %138 = arith.addf %135, %137 : vector<5x128xf32>
    %cst_66 = arith.constant 0.000000e+00 : f32
    %139 = vector.broadcast %cst_66 : f32 to vector<5x128xf32>
    %140 = arith.maximumf %138, %139 : vector<5x128xf32>
    %c25 = arith.constant 25 : index
    %c0_67 = arith.constant 0 : index
    %141 = vector.load %arg31[%c25, %c0_67] : memref<40x128xf32, #tpu.memory_space<vmem>>, vector<5x128xf32>
    tpu.vector_store %arg31[%c25, %c0_67], %140 {strides = array<i32>} : memref<40x128xf32, #tpu.memory_space<vmem>>, vector<5x128xf32>,
    %142 = vector.extract_strided_slice %48 {offsets = [6, 0], sizes = [1, 128], strides = [1, 1]} : vector<8x128xf32> to vector<1x128xf32>
    %143 = vector.broadcast %142 : vector<1x128xf32> to vector<6x128xf32>
    %144 = arith.addf %143, %63 : vector<6x128xf32>
    %cst_68 = arith.constant 0.000000e+00 : f32
    %145 = vector.broadcast %cst_68 : f32 to vector<6x128xf32>
    %146 = arith.maximumf %144, %145 : vector<6x128xf32>
    %c36 = arith.constant 36 : index
    %c0_69 = arith.constant 0 : index
    %147 = vector.load %arg30[%c36, %c0_69] : memref<48x128xf32, #tpu.memory_space<vmem>>, vector<6x128xf32>
    tpu.vector_store %arg30[%c36, %c0_69], %146 {strides = array<i32>} : memref<48x128xf32, #tpu.memory_space<vmem>>, vector<6x128xf32>,
    %148 = vector.extract_strided_slice %62 {offsets = [30, 0], sizes = [5, 128], strides = [1, 1]} : vector<40x128xf32> to vector<5x128xf32>
    %149 = vector.extract_strided_slice %49 {offsets = [6, 0], sizes = [1, 128], strides = [1, 1]} : vector<8x128xf32> to vector<1x128xf32>
    %150 = vector.broadcast %149 : vector<1x128xf32> to vector<5x128xf32>
    %151 = arith.addf %148, %150 : vector<5x128xf32>
    %cst_70 = arith.constant 0.000000e+00 : f32
    %152 = vector.broadcast %cst_70 : f32 to vector<5x128xf32>
    %153 = arith.maximumf %151, %152 : vector<5x128xf32>
    %c30_71 = arith.constant 30 : index
    %c0_72 = arith.constant 0 : index
    %154 = vector.load %arg31[%c30_71, %c0_72] : memref<40x128xf32, #tpu.memory_space<vmem>>, vector<5x128xf32>
    tpu.vector_store %arg31[%c30_71, %c0_72], %153 {strides = array<i32>} : memref<40x128xf32, #tpu.memory_space<vmem>>, vector<5x128xf32>,
    %155 = vector.extract_strided_slice %48 {offsets = [7, 0], sizes = [1, 128], strides = [1, 1]} : vector<8x128xf32> to vector<1x128xf32>
    %156 = vector.broadcast %155 : vector<1x128xf32> to vector<6x128xf32>
    %157 = arith.addf %156, %63 : vector<6x128xf32>
    %cst_73 = arith.constant 0.000000e+00 : f32
    %158 = vector.broadcast %cst_73 : f32 to vector<6x128xf32>
    %159 = arith.maximumf %157, %158 : vector<6x128xf32>
    %c42 = arith.constant 42 : index
    %c0_74 = arith.constant 0 : index
    %160 = vector.load %arg30[%c42, %c0_74] : memref<48x128xf32, #tpu.memory_space<vmem>>, vector<6x128xf32>
    tpu.vector_store %arg30[%c42, %c0_74], %159 {strides = array<i32>} : memref<48x128xf32, #tpu.memory_space<vmem>>, vector<6x128xf32>,
    %161 = vector.extract_strided_slice %62 {offsets = [35, 0], sizes = [5, 128], strides = [1, 1]} : vector<40x128xf32> to vector<5x128xf32>
    %162 = vector.extract_strided_slice %49 {offsets = [7, 0], sizes = [1, 128], strides = [1, 1]} : vector<8x128xf32> to vector<1x128xf32>
    %163 = vector.broadcast %162 : vector<1x128xf32> to vector<5x128xf32>
    %164 = arith.addf %161, %163 : vector<5x128xf32>
    %cst_75 = arith.constant 0.000000e+00 : f32
    %165 = vector.broadcast %cst_75 : f32 to vector<5x128xf32>
    %166 = arith.maximumf %164, %165 : vector<5x128xf32>
    %c35 = arith.constant 35 : index
    %c0_76 = arith.constant 0 : index
    %167 = vector.load %arg31[%c35, %c0_76] : memref<40x128xf32, #tpu.memory_space<vmem>>, vector<5x128xf32>
    tpu.vector_store %arg31[%c35, %c0_76], %166 {strides = array<i32>} : memref<40x128xf32, #tpu.memory_space<vmem>>, vector<5x128xf32>,
    %c0_77 = arith.constant 0 : index
    %c0_78 = arith.constant 0 : index
    %168 = vector.load %arg30[%c0_77, %c0_78] : memref<48x128xf32, #tpu.memory_space<vmem>>, vector<48x128xf32>
    %c0_79 = arith.constant 0 : index
    %c0_80 = arith.constant 0 : index
    %169 = vector.load %arg12[%c0_79, %c0_80] : memref<128x128xf32, #tpu.memory_space<vmem>>, vector<128x128xf32>
    %cst_81 = arith.constant dense<0.000000e+00> : vector<48x128xf32>
    %170 = tpu.matmul %168, %169, %cst_81 {dimension_numbers = #tpu.dot_dimension_numbers<[1], [0], [0], [1], [0, 0, 1, 1], [], []>} : vector<48x128xf32>, vector<128x128xf32>, vector<48x128xf32> -> vector<48x128xf32>
    %c0_82 = arith.constant 0 : index
    %c0_83 = arith.constant 0 : index
    %171 = vector.load %arg13[%c0_82, %c0_83] : memref<1x128xf32, #tpu.memory_space<vmem>>, vector<1x128xf32>
    %172 = vector.broadcast %171 : vector<1x128xf32> to vector<48x128xf32>
    %173 = arith.addf %170, %172 : vector<48x128xf32>
    %cst_84 = arith.constant 0.000000e+00 : f32
    %174 = vector.broadcast %cst_84 : f32 to vector<48x128xf32>
    %175 = arith.maximumf %173, %174 : vector<48x128xf32>
    %c0_85 = arith.constant 0 : index
    %c0_86 = arith.constant 0 : index
    %176 = vector.load %arg14[%c0_85, %c0_86] : memref<128x128xf32, #tpu.memory_space<vmem>>, vector<128x128xf32>
    %cst_87 = arith.constant dense<0.000000e+00> : vector<48x128xf32>
    %177 = tpu.matmul %175, %176, %cst_87 {dimension_numbers = #tpu.dot_dimension_numbers<[1], [0], [0], [1], [0, 0, 1, 1], [], []>} : vector<48x128xf32>, vector<128x128xf32>, vector<48x128xf32> -> vector<48x128xf32>
    %c0_88 = arith.constant 0 : index
    %c0_89 = arith.constant 0 : index
    %178 = vector.load %arg15[%c0_88, %c0_89] : memref<1x128xf32, #tpu.memory_space<vmem>>, vector<1x128xf32>
    %179 = vector.broadcast %178 : vector<1x128xf32> to vector<48x128xf32>
    %180 = arith.addf %177, %179 : vector<48x128xf32>
    %cst_90 = arith.constant 0.000000e+00 : f32
    %181 = vector.broadcast %cst_90 : f32 to vector<48x128xf32>
    %182 = arith.maximumf %180, %181 : vector<48x128xf32>
    %c0_91 = arith.constant 0 : index
    %c0_92 = arith.constant 0 : index
    %183 = vector.load %arg16[%c0_91, %c0_92] : memref<128x16xf32, #tpu.memory_space<vmem>>, vector<128x16xf32>
    %cst_93 = arith.constant dense<0.000000e+00> : vector<48x16xf32>
    %184 = tpu.matmul %182, %183, %cst_93 {dimension_numbers = #tpu.dot_dimension_numbers<[1], [0], [0], [1], [0, 0, 1, 1], [], []>} : vector<48x128xf32>, vector<128x16xf32>, vector<48x16xf32> -> vector<48x16xf32>
    %c0_94 = arith.constant 0 : index
    %c0_95 = arith.constant 0 : index
    %185 = vector.load %arg17[%c0_94, %c0_95] : memref<1x16xf32, #tpu.memory_space<vmem>>, vector<1x16xf32>
    %186 = vector.broadcast %185 : vector<1x16xf32> to vector<48x16xf32>
    %187 = arith.addf %184, %186 : vector<48x16xf32>
    %c0_96 = arith.constant 0 : index
    %c0_97 = arith.constant 0 : index
    %188 = vector.load %arg31[%c0_96, %c0_97] : memref<40x128xf32, #tpu.memory_space<vmem>>, vector<40x128xf32>
    %c0_98 = arith.constant 0 : index
    %c0_99 = arith.constant 0 : index
    %189 = vector.load %arg18[%c0_98, %c0_99] : memref<128x128xf32, #tpu.memory_space<vmem>>, vector<128x128xf32>
    %cst_100 = arith.constant dense<0.000000e+00> : vector<40x128xf32>
    %190 = tpu.matmul %188, %189, %cst_100 {dimension_numbers = #tpu.dot_dimension_numbers<[1], [0], [0], [1], [0, 0, 1, 1], [], []>} : vector<40x128xf32>, vector<128x128xf32>, vector<40x128xf32> -> vector<40x128xf32>
    %c0_101 = arith.constant 0 : index
    %c0_102 = arith.constant 0 : index
    %191 = vector.load %arg19[%c0_101, %c0_102] : memref<1x128xf32, #tpu.memory_space<vmem>>, vector<1x128xf32>
    %192 = vector.broadcast %191 : vector<1x128xf32> to vector<40x128xf32>
    %193 = arith.addf %190, %192 : vector<40x128xf32>
    %cst_103 = arith.constant 0.000000e+00 : f32
    %194 = vector.broadcast %cst_103 : f32 to vector<40x128xf32>
    %195 = arith.maximumf %193, %194 : vector<40x128xf32>
    %c0_104 = arith.constant 0 : index
    %c0_105 = arith.constant 0 : index
    %196 = vector.load %arg20[%c0_104, %c0_105] : memref<128x128xf32, #tpu.memory_space<vmem>>, vector<128x128xf32>
    %cst_106 = arith.constant dense<0.000000e+00> : vector<40x128xf32>
    %197 = tpu.matmul %195, %196, %cst_106 {dimension_numbers = #tpu.dot_dimension_numbers<[1], [0], [0], [1], [0, 0, 1, 1], [], []>} : vector<40x128xf32>, vector<128x128xf32>, vector<40x128xf32> -> vector<40x128xf32>
    %c0_107 = arith.constant 0 : index
    %c0_108 = arith.constant 0 : index
    %198 = vector.load %arg21[%c0_107, %c0_108] : memref<1x128xf32, #tpu.memory_space<vmem>>, vector<1x128xf32>
    %199 = vector.broadcast %198 : vector<1x128xf32> to vector<40x128xf32>
    %200 = arith.addf %197, %199 : vector<40x128xf32>
    %cst_109 = arith.constant 0.000000e+00 : f32
    %201 = vector.broadcast %cst_109 : f32 to vector<40x128xf32>
    %202 = arith.maximumf %200, %201 : vector<40x128xf32>
    %c0_110 = arith.constant 0 : index
    %c0_111 = arith.constant 0 : index
    %203 = vector.load %arg22[%c0_110, %c0_111] : memref<128x16xf32, #tpu.memory_space<vmem>>, vector<128x16xf32>
    %cst_112 = arith.constant dense<0.000000e+00> : vector<40x16xf32>
    %204 = tpu.matmul %202, %203, %cst_112 {dimension_numbers = #tpu.dot_dimension_numbers<[1], [0], [0], [1], [0, 0, 1, 1], [], []>} : vector<40x128xf32>, vector<128x16xf32>, vector<40x16xf32> -> vector<40x16xf32>
    %c0_113 = arith.constant 0 : index
    %c0_114 = arith.constant 0 : index
    %205 = vector.load %arg23[%c0_113, %c0_114] : memref<1x16xf32, #tpu.memory_space<vmem>>, vector<1x16xf32>
    %206 = vector.broadcast %205 : vector<1x16xf32> to vector<40x16xf32>
    %207 = arith.addf %204, %206 : vector<40x16xf32>
    %208 = vector.extract_strided_slice %187 {offsets = [0, 0], sizes = [6, 16], strides = [1, 1]} : vector<48x16xf32> to vector<6x16xf32>
    %c0_115 = arith.constant 0 : index
    %c0_116 = arith.constant 0 : index
    %c0_117 = arith.constant 0 : index
    %209 = vector.load %arg29[%c0_115, %c0_116, %c0_117] : memref<8x11x16xf32, #tpu.memory_space<vmem>>, vector<1x6x16xf32>
    %210 = vector.shape_cast %209 : vector<1x6x16xf32> to vector<6x16xf32>
    %211 = vector.shape_cast %208 : vector<6x16xf32> to vector<1x6x16xf32>
    tpu.vector_store %arg29[%c0_115, %c0_116, %c0_117], %211 {strides = array<i32>} : memref<8x11x16xf32, #tpu.memory_space<vmem>>, vector<1x6x16xf32>,
    %212 = vector.extract_strided_slice %207 {offsets = [0, 0], sizes = [5, 16], strides = [1, 1]} : vector<40x16xf32> to vector<5x16xf32>
    %c0_118 = arith.constant 0 : index
    %c6_119 = arith.constant 6 : index
    %c0_120 = arith.constant 0 : index
    %213 = vector.load %arg29[%c0_118, %c6_119, %c0_120] : memref<8x11x16xf32, #tpu.memory_space<vmem>>, vector<1x5x16xf32>
    %214 = vector.shape_cast %213 : vector<1x5x16xf32> to vector<5x16xf32>
    %215 = vector.shape_cast %212 : vector<5x16xf32> to vector<1x5x16xf32>
    tpu.vector_store %arg29[%c0_118, %c6_119, %c0_120], %215 {strides = array<i32>} : memref<8x11x16xf32, #tpu.memory_space<vmem>>, vector<1x5x16xf32>,
    %216 = vector.extract_strided_slice %187 {offsets = [6, 0], sizes = [6, 16], strides = [1, 1]} : vector<48x16xf32> to vector<6x16xf32>
    %c1 = arith.constant 1 : index
    %c0_121 = arith.constant 0 : index
    %c0_122 = arith.constant 0 : index
    %217 = vector.load %arg29[%c1, %c0_121, %c0_122] : memref<8x11x16xf32, #tpu.memory_space<vmem>>, vector<1x6x16xf32>
    %218 = vector.shape_cast %217 : vector<1x6x16xf32> to vector<6x16xf32>
    %219 = vector.shape_cast %216 : vector<6x16xf32> to vector<1x6x16xf32>
    tpu.vector_store %arg29[%c1, %c0_121, %c0_122], %219 {strides = array<i32>} : memref<8x11x16xf32, #tpu.memory_space<vmem>>, vector<1x6x16xf32>,
    %220 = vector.extract_strided_slice %207 {offsets = [5, 0], sizes = [5, 16], strides = [1, 1]} : vector<40x16xf32> to vector<5x16xf32>
    %c1_123 = arith.constant 1 : index
    %c6_124 = arith.constant 6 : index
    %c0_125 = arith.constant 0 : index
    %221 = vector.load %arg29[%c1_123, %c6_124, %c0_125] : memref<8x11x16xf32, #tpu.memory_space<vmem>>, vector<1x5x16xf32>
    %222 = vector.shape_cast %221 : vector<1x5x16xf32> to vector<5x16xf32>
    %223 = vector.shape_cast %220 : vector<5x16xf32> to vector<1x5x16xf32>
    tpu.vector_store %arg29[%c1_123, %c6_124, %c0_125], %223 {strides = array<i32>} : memref<8x11x16xf32, #tpu.memory_space<vmem>>, vector<1x5x16xf32>,
    %224 = vector.extract_strided_slice %187 {offsets = [12, 0], sizes = [6, 16], strides = [1, 1]} : vector<48x16xf32> to vector<6x16xf32>
    %c2 = arith.constant 2 : index
    %c0_126 = arith.constant 0 : index
    %c0_127 = arith.constant 0 : index
    %225 = vector.load %arg29[%c2, %c0_126, %c0_127] : memref<8x11x16xf32, #tpu.memory_space<vmem>>, vector<1x6x16xf32>
    %226 = vector.shape_cast %225 : vector<1x6x16xf32> to vector<6x16xf32>
    %227 = vector.shape_cast %224 : vector<6x16xf32> to vector<1x6x16xf32>
    tpu.vector_store %arg29[%c2, %c0_126, %c0_127], %227 {strides = array<i32>} : memref<8x11x16xf32, #tpu.memory_space<vmem>>, vector<1x6x16xf32>,
    %228 = vector.extract_strided_slice %207 {offsets = [10, 0], sizes = [5, 16], strides = [1, 1]} : vector<40x16xf32> to vector<5x16xf32>
    %c2_128 = arith.constant 2 : index
    %c6_129 = arith.constant 6 : index
    %c0_130 = arith.constant 0 : index
    %229 = vector.load %arg29[%c2_128, %c6_129, %c0_130] : memref<8x11x16xf32, #tpu.memory_space<vmem>>, vector<1x5x16xf32>
    %230 = vector.shape_cast %229 : vector<1x5x16xf32> to vector<5x16xf32>
    %231 = vector.shape_cast %228 : vector<5x16xf32> to vector<1x5x16xf32>
    tpu.vector_store %arg29[%c2_128, %c6_129, %c0_130], %231 {strides = array<i32>} : memref<8x11x16xf32, #tpu.memory_space<vmem>>, vector<1x5x16xf32>,
    %232 = vector.extract_strided_slice %187 {offsets = [18, 0], sizes = [6, 16], strides = [1, 1]} : vector<48x16xf32> to vector<6x16xf32>
    %c3 = arith.constant 3 : index
    %c0_131 = arith.constant 0 : index
    %c0_132 = arith.constant 0 : index
    %233 = vector.load %arg29[%c3, %c0_131, %c0_132] : memref<8x11x16xf32, #tpu.memory_space<vmem>>, vector<1x6x16xf32>
    %234 = vector.shape_cast %233 : vector<1x6x16xf32> to vector<6x16xf32>
    %235 = vector.shape_cast %232 : vector<6x16xf32> to vector<1x6x16xf32>
    tpu.vector_store %arg29[%c3, %c0_131, %c0_132], %235 {strides = array<i32>} : memref<8x11x16xf32, #tpu.memory_space<vmem>>, vector<1x6x16xf32>,
    %236 = vector.extract_strided_slice %207 {offsets = [15, 0], sizes = [5, 16], strides = [1, 1]} : vector<40x16xf32> to vector<5x16xf32>
    %c3_133 = arith.constant 3 : index
    %c6_134 = arith.constant 6 : index
    %c0_135 = arith.constant 0 : index
    %237 = vector.load %arg29[%c3_133, %c6_134, %c0_135] : memref<8x11x16xf32, #tpu.memory_space<vmem>>, vector<1x5x16xf32>
    %238 = vector.shape_cast %237 : vector<1x5x16xf32> to vector<5x16xf32>
    %239 = vector.shape_cast %236 : vector<5x16xf32> to vector<1x5x16xf32>
    tpu.vector_store %arg29[%c3_133, %c6_134, %c0_135], %239 {strides = array<i32>} : memref<8x11x16xf32, #tpu.memory_space<vmem>>, vector<1x5x16xf32>,
    %240 = vector.extract_strided_slice %187 {offsets = [24, 0], sizes = [6, 16], strides = [1, 1]} : vector<48x16xf32> to vector<6x16xf32>
    %c4 = arith.constant 4 : index
    %c0_136 = arith.constant 0 : index
    %c0_137 = arith.constant 0 : index
    %241 = vector.load %arg29[%c4, %c0_136, %c0_137] : memref<8x11x16xf32, #tpu.memory_space<vmem>>, vector<1x6x16xf32>
    %242 = vector.shape_cast %241 : vector<1x6x16xf32> to vector<6x16xf32>
    %243 = vector.shape_cast %240 : vector<6x16xf32> to vector<1x6x16xf32>
    tpu.vector_store %arg29[%c4, %c0_136, %c0_137], %243 {strides = array<i32>} : memref<8x11x16xf32, #tpu.memory_space<vmem>>, vector<1x6x16xf32>,
    %244 = vector.extract_strided_slice %207 {offsets = [20, 0], sizes = [5, 16], strides = [1, 1]} : vector<40x16xf32> to vector<5x16xf32>
    %c4_138 = arith.constant 4 : index
    %c6_139 = arith.constant 6 : index
    %c0_140 = arith.constant 0 : index
    %245 = vector.load %arg29[%c4_138, %c6_139, %c0_140] : memref<8x11x16xf32, #tpu.memory_space<vmem>>, vector<1x5x16xf32>
    %246 = vector.shape_cast %245 : vector<1x5x16xf32> to vector<5x16xf32>
    %247 = vector.shape_cast %244 : vector<5x16xf32> to vector<1x5x16xf32>
    tpu.vector_store %arg29[%c4_138, %c6_139, %c0_140], %247 {strides = array<i32>} : memref<8x11x16xf32, #tpu.memory_space<vmem>>, vector<1x5x16xf32>,
    %248 = vector.extract_strided_slice %187 {offsets = [30, 0], sizes = [6, 16], strides = [1, 1]} : vector<48x16xf32> to vector<6x16xf32>
    %c5_141 = arith.constant 5 : index
    %c0_142 = arith.constant 0 : index
    %c0_143 = arith.constant 0 : index
    %249 = vector.load %arg29[%c5_141, %c0_142, %c0_143] : memref<8x11x16xf32, #tpu.memory_space<vmem>>, vector<1x6x16xf32>
    %250 = vector.shape_cast %249 : vector<1x6x16xf32> to vector<6x16xf32>
    %251 = vector.shape_cast %248 : vector<6x16xf32> to vector<1x6x16xf32>
    tpu.vector_store %arg29[%c5_141, %c0_142, %c0_143], %251 {strides = array<i32>} : memref<8x11x16xf32, #tpu.memory_space<vmem>>, vector<1x6x16xf32>,
    %252 = vector.extract_strided_slice %207 {offsets = [25, 0], sizes = [5, 16], strides = [1, 1]} : vector<40x16xf32> to vector<5x16xf32>
    %c5_144 = arith.constant 5 : index
    %c6_145 = arith.constant 6 : index
    %c0_146 = arith.constant 0 : index
    %253 = vector.load %arg29[%c5_144, %c6_145, %c0_146] : memref<8x11x16xf32, #tpu.memory_space<vmem>>, vector<1x5x16xf32>
    %254 = vector.shape_cast %253 : vector<1x5x16xf32> to vector<5x16xf32>
    %255 = vector.shape_cast %252 : vector<5x16xf32> to vector<1x5x16xf32>
    tpu.vector_store %arg29[%c5_144, %c6_145, %c0_146], %255 {strides = array<i32>} : memref<8x11x16xf32, #tpu.memory_space<vmem>>, vector<1x5x16xf32>,
    %256 = vector.extract_strided_slice %187 {offsets = [36, 0], sizes = [6, 16], strides = [1, 1]} : vector<48x16xf32> to vector<6x16xf32>
    %c6_147 = arith.constant 6 : index
    %c0_148 = arith.constant 0 : index
    %c0_149 = arith.constant 0 : index
    %257 = vector.load %arg29[%c6_147, %c0_148, %c0_149] : memref<8x11x16xf32, #tpu.memory_space<vmem>>, vector<1x6x16xf32>
    %258 = vector.shape_cast %257 : vector<1x6x16xf32> to vector<6x16xf32>
    %259 = vector.shape_cast %256 : vector<6x16xf32> to vector<1x6x16xf32>
    tpu.vector_store %arg29[%c6_147, %c0_148, %c0_149], %259 {strides = array<i32>} : memref<8x11x16xf32, #tpu.memory_space<vmem>>, vector<1x6x16xf32>,
    %260 = vector.extract_strided_slice %207 {offsets = [30, 0], sizes = [5, 16], strides = [1, 1]} : vector<40x16xf32> to vector<5x16xf32>
    %c6_150 = arith.constant 6 : index
    %c6_151 = arith.constant 6 : index
    %c0_152 = arith.constant 0 : index
    %261 = vector.load %arg29[%c6_150, %c6_151, %c0_152] : memref<8x11x16xf32, #tpu.memory_space<vmem>>, vector<1x5x16xf32>
    %262 = vector.shape_cast %261 : vector<1x5x16xf32> to vector<5x16xf32>
    %263 = vector.shape_cast %260 : vector<5x16xf32> to vector<1x5x16xf32>
    tpu.vector_store %arg29[%c6_150, %c6_151, %c0_152], %263 {strides = array<i32>} : memref<8x11x16xf32, #tpu.memory_space<vmem>>, vector<1x5x16xf32>,
    %264 = vector.extract_strided_slice %187 {offsets = [42, 0], sizes = [6, 16], strides = [1, 1]} : vector<48x16xf32> to vector<6x16xf32>
    %c7 = arith.constant 7 : index
    %c0_153 = arith.constant 0 : index
    %c0_154 = arith.constant 0 : index
    %265 = vector.load %arg29[%c7, %c0_153, %c0_154] : memref<8x11x16xf32, #tpu.memory_space<vmem>>, vector<1x6x16xf32>
    %266 = vector.shape_cast %265 : vector<1x6x16xf32> to vector<6x16xf32>
    %267 = vector.shape_cast %264 : vector<6x16xf32> to vector<1x6x16xf32>
    tpu.vector_store %arg29[%c7, %c0_153, %c0_154], %267 {strides = array<i32>} : memref<8x11x16xf32, #tpu.memory_space<vmem>>, vector<1x6x16xf32>,
    %268 = vector.extract_strided_slice %207 {offsets = [35, 0], sizes = [5, 16], strides = [1, 1]} : vector<40x16xf32> to vector<5x16xf32>
    %c7_155 = arith.constant 7 : index
    %c6_156 = arith.constant 6 : index
    %c0_157 = arith.constant 0 : index
    %269 = vector.load %arg29[%c7_155, %c6_156, %c0_157] : memref<8x11x16xf32, #tpu.memory_space<vmem>>, vector<1x5x16xf32>
    %270 = vector.shape_cast %269 : vector<1x5x16xf32> to vector<5x16xf32>
    %271 = vector.shape_cast %268 : vector<5x16xf32> to vector<1x5x16xf32>
    tpu.vector_store %arg29[%c7_155, %c6_156, %c0_157], %271 {strides = array<i32>} : memref<8x11x16xf32, #tpu.memory_space<vmem>>, vector<1x5x16xf32>,
    return
  }
}

</mosaic_0001>

<bundles_post_ra>
// kernel: value_module_forward.1
= control target key start
LH: loop header
LB: loop body
LE: loop exit
PB: predicated region body
PF: predicated region fallthrough
CT: control target
= control target key end

     0   :  { %s1958_s6 = smov 1   ;;  %s1959_s10 = smov 2   ;;  %s2432_s0 = inlined_call_operand.smem [shape: u32[30], index: -1, kind: input, shape index: {}] }
   0x1   :  { %s2023_s5 = sld [smem:[%s2432_s0]]   ;;  %s1960_s14 = smov 3  }
   0x2   :  { %s2028_s9 = sld [smem:[%s2432_s0 + %s1958_s6]]   ;;  %s1961_s18 = smov 4  }
   0x3   :  { %s2033_s13 = sld [smem:[%s2432_s0 + %s1959_s10]]   ;;  %s1962_s22 = smov 5  }
   0x4   :  { %s2038_s17 = sld [smem:[%s2432_s0 + %s1960_s14]]   ;;  %s1963_s26 = smov 6  }
   0x5   :  { %s2043_s21 = sld [smem:[%s2432_s0 + %s1961_s18]]   ;;  %s1964_s30 = smov 7  }
   0x6   :  { %s2048_s25 = sld [smem:[%s2432_s0 + %s1962_s22]]   ;;  %s1965_s4 = smov 8  }
   0x7   :  { %s2053_s29 = sld [smem:[%s2432_s0 + %s1963_s26]]   ;;  %s1966_s10 = smov 9  }
   0x8   :  { %2444 = sst [smem:[#allocation47_spill]] %s2028_s9  ;;  %s1967_s15 = smov 10  }
   0x9   :  { %s2058_s3 = sld [smem:[%s2432_s0 + %s1964_s30]]   ;;  %s1968_s20 = smov 11  }
   0xa   :  { %2445 = sst [smem:[#allocation48_spill]] %s2038_s17  ;;  %s1969_s26 = smov 12  }
   0xb   :  { %s2063_s8 = sld [smem:[%s2432_s0 + %s1965_s4]]   ;;  %s1970_s1 = smov 13  }
   0xc   :  { %s2068_s14 = sld [smem:[%s2432_s0 + %s1966_s10]]   ;;  %s1971_s7 = smov 14  }
   0xd   :  { %s2073_s19 = sld [smem:[%s2432_s0 + %s1967_s15]]   ;;  %s1972_s15 = smov 15  }
   0xe   :  { %s2078_s24 = sld [smem:[%s2432_s0 + %s1968_s20]]   ;;  %s1973_s22 = smov 16  }
   0xf   :  { %s2083_s30 = sld [smem:[%s2432_s0 + %s1969_s26]]   ;;  %s1974_s28 = smov 17  }
  0x10   :  { %s2088_s6 = sld [smem:[%s2432_s0 + %s1970_s1]]  }
  0x11   :  { %2446 = sst [smem:[#allocation49_spill]] %s2063_s8 }
  0x12   :  { %s2093_s12 = sld [smem:[%s2432_s0 + %s1971_s7]]   ;;  %s1975_s7 = smov 18  }
  0x13   :  { %s2098_s20 = sld [smem:[%s2432_s0 + %s1972_s15]]   ;;  %s1976_s15 = smov 19  }
  0x14   :  { %2447 = sst [smem:[#allocation50_spill]] %s2078_s24 }
  0x15   :  { %s2103_s27 = sld [smem:[%s2432_s0 + %s1973_s22]]   ;;  %s1977_s22 = smov 20  }
  0x16   :  { %2448 = sst [smem:[#allocation51_spill]] %s2088_s6 }
  0x17   :  { %s2108_s4 = sld [smem:[%s2432_s0 + %s1974_s28]]   ;;  %s1978_s28 = smov 21  }
  0x18   :  { %s2113_s8 = sld [smem:[%s2432_s0 + %s1975_s7]]   ;;  %s1979_s7 = smov 22  }
  0x19   :  { %2449 = sst [smem:[#allocation52_spill]] %s2098_s20 }
  0x1a   :  { %s2118_s17 = sld [smem:[%s2432_s0 + %s1976_s15]]   ;;  %s1980_s15 = smov 23  }
  0x1b   :  { %s2123_s9 = sld [smem:[%s2432_s0 + %s1977_s22]]   ;;  %s1981_s22 = smov 24  }
  0x1c   :  { %s2133_s20 = sld [smem:[%s2432_s0 + %s1979_s7]]   ;;  %s1983_s7 = smov 26  }
  0x1d   :  { %2450 = sst [smem:[#allocation53_spill]] %s2108_s4 }
  0x1e   :  { %s2128_s4 = sld [smem:[%s2432_s0 + %s1978_s28]]   ;;  %s1982_s28 = smov 25  }
  0x1f   :  { %s2143_s6 = sld [smem:[%s2432_s0 + %s1981_s22]]   ;;  %s1985_s22 = smov 28  }
  0x20   :  { %2451 = sst [smem:[#allocation54_spill]] %s2118_s17 }
  0x21   :  { %s2138_s17 = sld [smem:[%s2432_s0 + %s1980_s15]]   ;;  %s1984_s15 = smov 27  }
  0x22   :  { %2453 = sst [smem:[#allocation56_spill]] %s2133_s20 }
  0x23   :  { %s2153_s20 = sld [smem:[%s2432_s0 + %s1983_s7]]  }
  0x24   :  { %2452 = sst [smem:[#allocation55_spill]] %s2128_s4 }
  0x25   :  { %2454 = sst [smem:[#allocation57_spill]] %s2143_s6 }
  0x26   :  { %s2148_s4 = sld [smem:[%s2432_s0 + %s1982_s28]]   ;;  %s1986_s28 = smov 29  }
  0x27   :  { %s2158_s24 = sld [smem:[%s2432_s0 + %s1984_s15]]  }
  0x28   :  { %s2163_s6 = sld [smem:[%s2432_s0 + %s1985_s22]]  }
  0x2c   :  { %2455 = sst [smem:[#allocation58_spill]] %s2148_s4 }
  0x2d   :  { %s2168_s4 = sld [smem:[%s2432_s0 + %s1986_s28]]  }
  0x2e   :  { %65 = vsyncpa [#allocation5], 0 }
  0x2f   :  { %66 = vsyncpa [#allocation7], 0 }
  0x30   :  { %67 = vsyncpa [#allocation10], 0 }
  0x31   :  { %68 = vsyncpa [#allocation13], 0 }
  0x32   :  { %69 = vsyncpa [#allocation16], 0 }
  0x33   :  { %70 = vsyncpa [#allocation19], 0 }
  0x34   :  { %71 = vsyncpa [#allocation22], 0 }
  0x35   :  { %72 = vsyncpa [#allocation25], 0 }
  0x36   :  { %73 = vsyncpa [#allocation28], 0 }
  0x37   :  { %74 = vsyncpa [#allocation31], 0  ;;  %s94_s7 = sshll.u32 %s2033_s13, 4  ;;  %s95_s7 = int_to_ptr.hbm [resolvable:$true] %s94_s7 }
  0x38   :  { %75 = vsyncpa [#allocation34], 0  ;;  %s1987_s10 = smov [#allocation6]   ;;  %s1432_s0 = sshra.s32 %s95_s7, 4  ;;  %s1433_s0 = int_to_ptr.hbm [resolvable:$true] %s1432_s0 }
  0x39   :  { %s96_s11 = sshll.u32 %s1987_s10, 4  ;;  %s1434_s15 = scalar_lea.hbm %s1433_s0, 8  ;;  %s97_s11 = int_to_ptr.vmem [resolvable:$true] %s96_s11 }
  0x3a   :  { %p1435_p0 = scmp.ne.s32.totalorder %s1433_s0, %s1434_s15  ;;  %s1436_s16 = scalar_lea.hbm %s2033_s13, 8 }
  0x3b   :  { %p1437_p1 = scmp.lt.s32.totalorder %s1433_s0, %s2033_s13  ;;  %p1438_p2 = scmp.lt.s32.totalorder %s1436_s16, %s1434_s15 }
  0x3d   :  { %p1439_p3 = por %p1438_p2, %p1437_p1 }
  0x3f   :  { %p1440_p4 = pnand %p1439_p3, %p1435_p0 }
  0x41   :  { %1443 = shalt.err (!%p1440_p4)
}
  0x42   :  { %99 = dma.hbm_to_vmem [thread:$0]  %s95_s7, 128, %s97_s11, [#allocation7]  }
  0x43   :  { %s119_s18 = sshll.u32 %s2048_s25, 4  ;;  %s1988_s22 = smov [#allocation9]   ;;  %s120_s18 = int_to_ptr.hbm [resolvable:$true] %s119_s18 }
  0x44   :  { %s121_s23 = sshll.u32 %s1988_s22, 4  ;;  %s144_s26 = sshll.u32 %s2058_s3, 4  ;;  %s122_s23 = int_to_ptr.vmem [resolvable:$true] %s121_s23  ;;  %s2175_s26 = int_to_ptr.hbm [resolvable:$true] %s144_s26 }
  0x45   :  { %s1456_s28 = sshra.s32 %s120_s18, 4  ;;  %s1460_s1 = scalar_lea.hbm %s2048_s25, 32  ;;  %s1457_s28 = int_to_ptr.hbm [resolvable:$true] %s1456_s28 }
  0x46   :  { %s1458_s13 = scalar_lea.hbm %s1457_s28, 32  ;;  %p1461_p6 = scmp.lt.s32.totalorder %s1457_s28, %s2048_s25 }
  0x47   :  { %p1459_p5 = scmp.ne.s32.totalorder %s1457_s28, %s1458_s13  ;;  %p1462_p7 = scmp.lt.s32.totalorder %s1460_s1, %s1458_s13 }
  0x49   :  { %p1463_p8 = por %p1462_p7, %p1461_p6 }
  0x4b   :  { %p1464_p9 = pnand %p1463_p8, %p1459_p5 }
  0x4d   :  { %1467 = shalt.err (!%p1464_p9)
}
  0x4e   :  { %s1989_s2 = smov 128   ;;  %s1990_s7 = smov 8  }
  0x4f   :  { %127 = dma.hbm_to_vmem [thread:$0]  %s120_s18, 512, %s122_s23, [#allocation10], %s1989_s2, %s1989_s2, %s1990_s7  }
  0x50   :  { %s170_s10 = sshll.u32 %s2073_s19, 4  ;;  %s1991_s11 = smov [#allocation12]   ;;  %s171_s10 = int_to_ptr.hbm [resolvable:$true] %s170_s10 }
  0x51   :  { %s146_s0 = sshll.u32 %s1991_s11, 4  ;;  %s1480_s25 = sshra.s32 %s2175_s26, 4  ;;  %s147_s0 = int_to_ptr.vmem [resolvable:$true] %s146_s0  ;;  %s1481_s25 = int_to_ptr.hbm [resolvable:$true] %s1480_s25 }
  0x52   :  { %s1482_s15 = scalar_lea.hbm %s1481_s25, 1  ;;  %s1484_s16 = scalar_lea.hbm %s2058_s3, 1 }
  0x53   :  { %p1483_p10 = scmp.ne.s32.totalorder %s1481_s25, %s1482_s15  ;;  %p1485_p11 = scmp.lt.s32.totalorder %s1481_s25, %s2058_s3 }
  0x54   :  { %p1486_p12 = scmp.lt.s32.totalorder %s1484_s16, %s1482_s15 }
  0x56   :  { %p1487_p13 = por %p1486_p12, %p1485_p11 }
  0x58   :  { %p1488_p0 = pnand %p1487_p13, %p1483_p10 }
  0x5a   :  { %1491 = shalt.err (!%p1488_p0)
}
  0x5b   :  { %149 = dma.hbm_to_vmem [thread:$0]  %s2175_s26, 16, %s147_s0, [#allocation13]  }
  0x5c   :  { %s1992_s18 = smov [#allocation15]   ;;  %s191_s23 = sshll.u32 %s2083_s30, 4  ;;  %s2188_s23 = int_to_ptr.hbm [resolvable:$true] %s191_s23 }
  0x5d   :  { %s172_s22 = sshll.u32 %s1992_s18, 4  ;;  %s1504_s28 = sshra.s32 %s171_s10, 4  ;;  %s173_s22 = int_to_ptr.vmem [resolvable:$true] %s172_s22  ;;  %s1505_s28 = int_to_ptr.hbm [resolvable:$true] %s1504_s28 }
  0x5e   :  { %s1506_s13 = scalar_lea.hbm %s1505_s28, 2  ;;  %s1508_s3 = scalar_lea.hbm %s2073_s19, 2 }
  0x5f   :  { %p1507_p1 = scmp.ne.s32.totalorder %s1505_s28, %s1506_s13  ;;  %p1509_p2 = scmp.lt.s32.totalorder %s1505_s28, %s2073_s19 }
  0x60   :  { %p1510_p3 = scmp.lt.s32.totalorder %s1508_s3, %s1506_s13 }
  0x62   :  { %p1511_p4 = por %p1510_p3, %p1509_p2 }
  0x64   :  { %p1512_p5 = pnand %p1511_p4, %p1507_p1 }
  0x66   :  { %1515 = shalt.err (!%p1512_p5)
}
  0x67   :  { %175 = dma.hbm_to_vmem [thread:$0]  %s171_s10, 32, %s173_s22, [#allocation16]  }
  0x68   :  { %s215_s26 = sshll.u32 %s2093_s12, 4  ;;  %s1993_s1 = smov [#allocation18]   ;;  %s2193_s26 = int_to_ptr.hbm [resolvable:$true] %s215_s26 }
  0x69   :  { %s193_s11 = sshll.u32 %s1993_s1, 4  ;;  %s1528_s0 = sshra.s32 %s2188_s23, 4  ;;  %s194_s11 = int_to_ptr.vmem [resolvable:$true] %s193_s11  ;;  %s1529_s0 = int_to_ptr.hbm [resolvable:$true] %s1528_s0 }
  0x6a   :  { %s1530_s25 = scalar_lea.hbm %s1529_s0, 128  ;;  %s1532_s19 = scalar_lea.hbm %s2083_s30, 128 }
  0x6b   :  { %p1531_p6 = scmp.ne.s32.totalorder %s1529_s0, %s1530_s25  ;;  %p1533_p7 = scmp.lt.s32.totalorder %s1529_s0, %s2083_s30 }
  0x6c   :  { %p1534_p8 = scmp.lt.s32.totalorder %s1532_s19, %s1530_s25 }
  0x6e   :  { %p1535_p9 = por %p1534_p8, %p1533_p7 }
  0x70   :  { %p1536_p10 = pnand %p1535_p9, %p1531_p6 }
  0x72   :  { %1539 = shalt.err (!%p1536_p10)
}
  0x73   :  { %199 = dma.hbm_to_vmem [thread:$0]  %s2188_s23, 2048, %s194_s11, [#allocation19], %s1989_s2, %s1989_s2, %s1990_s7  }
  0x74   :  { %s1994_s10 = smov [#allocation21]   ;;  %s239_s16 = sshll.u32 %s2103_s27, 4  ;;  %s2203_s16 = int_to_ptr.hbm [resolvable:$true] %s239_s16 }
  0x75   :  { %s217_s15 = sshll.u32 %s1994_s10, 4  ;;  %s1552_s30 = sshra.s32 %s2193_s26, 4  ;;  %s218_s15 = int_to_ptr.vmem [resolvable:$true] %s217_s15  ;;  %s1553_s30 = int_to_ptr.hbm [resolvable:$true] %s1552_s30 }
  0x76   :  { %s1554_s18 = scalar_lea.hbm %s1553_s30, 128  ;;  %s1556_s22 = scalar_lea.hbm %s2093_s12, 128 }
  0x77   :  { %p1555_p11 = scmp.ne.s32.totalorder %s1553_s30, %s1554_s18  ;;  %p1557_p12 = scmp.lt.s32.totalorder %s1553_s30, %s2093_s12 }
  0x78   :  { %p1558_p13 = scmp.lt.s32.totalorder %s1556_s22, %s1554_s18 }
  0x7a   :  { %p1559_p0 = por %p1558_p13, %p1557_p12 }
  0x7c   :  { %p1560_p1 = pnand %p1559_p0, %p1555_p11 }
  0x7e   :  { %1563 = shalt.err (!%p1560_p1)
}
  0x7f   :  { %223 = dma.hbm_to_vmem [thread:$0]  %s2193_s26, 2048, %s218_s15, [#allocation22], %s1989_s2, %s1989_s2, %s1990_s7  }
  0x80   :  { %s263_s23 = sshll.u32 %s2113_s8, 4  ;;  %s1995_s28 = smov [#allocation24]   ;;  %s2213_s23 = int_to_ptr.hbm [resolvable:$true] %s263_s23 }
  0x81   :  { %s241_s13 = sshll.u32 %s1995_s28, 4  ;;  %s1576_s12 = sshra.s32 %s2203_s16, 4  ;;  %s242_s13 = int_to_ptr.vmem [resolvable:$true] %s241_s13  ;;  %s1577_s12 = int_to_ptr.hbm [resolvable:$true] %s1576_s12 }
  0x82   :  { %s1578_s3 = scalar_lea.hbm %s1577_s12, 128  ;;  %s1580_s1 = scalar_lea.hbm %s2103_s27, 128 }
  0x83   :  { %p1579_p2 = scmp.ne.s32.totalorder %s1577_s12, %s1578_s3  ;;  %p1581_p3 = scmp.lt.s32.totalorder %s1577_s12, %s2103_s27 }
  0x84   :  { %p1582_p4 = scmp.lt.s32.totalorder %s1580_s1, %s1578_s3 }
  0x86   :  { %p1583_p5 = por %p1582_p4, %p1581_p3 }
  0x88   :  { %p1584_p6 = pnand %p1583_p5, %p1579_p2 }
  0x8a   :  { %1587 = shalt.err (!%p1584_p6)
}
  0x8b   :  { %247 = dma.hbm_to_vmem [thread:$0]  %s2203_s16, 2048, %s242_s13, [#allocation25], %s1989_s2, %s1989_s2, %s1990_s7  }
  0x8c   :  { %s1996_s26 = smov [#allocation27]   ;;  %s287_s0 = sshll.u32 %s2123_s9, 4  ;;  %s2223_s0 = int_to_ptr.hbm [resolvable:$true] %s287_s0 }
  0x8d   :  { %s265_s11 = sshll.u32 %s1996_s26, 4  ;;  %s1600_s27 = sshra.s32 %s2213_s23, 4  ;;  %s266_s11 = int_to_ptr.vmem [resolvable:$true] %s265_s11  ;;  %s1601_s27 = int_to_ptr.hbm [resolvable:$true] %s1600_s27 }
  0x8e   :  { %s1602_s25 = scalar_lea.hbm %s1601_s27, 128  ;;  %s1604_s19 = scalar_lea.hbm %s2113_s8, 128 }
  0x8f   :  { %p1603_p7 = scmp.ne.s32.totalorder %s1601_s27, %s1602_s25  ;;  %p1605_p8 = scmp.lt.s32.totalorder %s1601_s27, %s2113_s8 }
  0x90   :  { %p1606_p9 = scmp.lt.s32.totalorder %s1604_s19, %s1602_s25 }
  0x92   :  { %p1607_p10 = por %p1606_p9, %p1605_p8 }
  0x94   :  { %p1608_p11 = pnand %p1607_p10, %p1603_p7 }
  0x96   :  { %1611 = shalt.err (!%p1608_p11)
}
  0x97   :  { %271 = dma.hbm_to_vmem [thread:$0]  %s2213_s23, 2048, %s266_s11, [#allocation28], %s1989_s2, %s1989_s2, %s1990_s7  }
  0x98   :  { %s314_s10 = sshll.u32 %s2138_s17, 4  ;;  %s1997_s15 = smov [#allocation30]   ;;  %s315_s10 = int_to_ptr.hbm [resolvable:$true] %s314_s10 }
  0x99   :  { %s289_s16 = sshll.u32 %s1997_s15, 4  ;;  %s1624_s30 = sshra.s32 %s2223_s0, 4  ;;  %s290_s16 = int_to_ptr.vmem [resolvable:$true] %s289_s16  ;;  %s1625_s30 = int_to_ptr.hbm [resolvable:$true] %s1624_s30 }
  0x9a   :  { %s1626_s8 = scalar_lea.hbm %s1625_s30, 128  ;;  %s1628_s18 = scalar_lea.hbm %s2123_s9, 128 }
  0x9b   :  { %p1627_p12 = scmp.ne.s32.totalorder %s1625_s30, %s1626_s8  ;;  %p1629_p13 = scmp.lt.s32.totalorder %s1625_s30, %s2123_s9 }
  0x9c   :  { %p1630_p0 = scmp.lt.s32.totalorder %s1628_s18, %s1626_s8 }
  0x9e   :  { %p1631_p1 = por %p1630_p0, %p1629_p13 }
  0xa0   :  { %p1632_p2 = pnand %p1631_p1, %p1627_p12 }
  0xa2   :  { %1635 = shalt.err (!%p1632_p2)
}
  0xa3   :  { %295 = dma.hbm_to_vmem [thread:$0]  %s2223_s0, 2048, %s290_s16, [#allocation31], %s1989_s2, %s1989_s2, %s1990_s7  }
  0xa4   :  { %s1998_s22 = smov [#allocation33]   ;;  %s81_s28 = sshll.u32 %s2023_s5, 4  ;;  %s82_s28 = int_to_ptr.hbm [resolvable:$true] %s81_s28 }
  0xa5   :  { %s316_s23 = sshll.u32 %s1998_s22, 4  ;;  %s1648_s13 = sshra.s32 %s315_s10, 4  ;;  %s317_s23 = int_to_ptr.vmem [resolvable:$true] %s316_s23  ;;  %s1649_s13 = int_to_ptr.hbm [resolvable:$true] %s1648_s13 }
  0xa6   :  { %s1650_s9 = scalar_lea.hbm %s1649_s13, 1  ;;  %s1652_s12 = scalar_lea.hbm %s2138_s17, 1 }
  0xa7   :  { %p1651_p3 = scmp.ne.s32.totalorder %s1649_s13, %s1650_s9  ;;  %p1653_p4 = scmp.lt.s32.totalorder %s1649_s13, %s2138_s17 }
  0xa8   :  { %p1654_p5 = scmp.lt.s32.totalorder %s1652_s12, %s1650_s9 }
  0xaa   :  { %p1655_p6 = por %p1654_p5, %p1653_p4 }
  0xac   :  { %p1656_p7 = pnand %p1655_p6, %p1651_p3 }
  0xae   :  { %1659 = shalt.err (!%p1656_p7)
}
  0xaf   :  { %319 = dma.hbm_to_vmem [thread:$0]  %s315_s10, 16, %s317_s23, [#allocation34]  }
  0xb0   :  { %s106_s3 = sshll.u32 %s2043_s21, 4  ;;  %s1999_s1 = smov [#allocation4]   ;;  %s2244_s3 = int_to_ptr.hbm [resolvable:$true] %s106_s3 }
  0xb1   :  { %s83_s26 = sshll.u32 %s1999_s1, 4  ;;  %s1672_s11 = sshra.s32 %s82_s28, 4  ;;  %s84_s26 = int_to_ptr.vmem [resolvable:$true] %s83_s26  ;;  %s1673_s11 = int_to_ptr.hbm [resolvable:$true] %s1672_s11 }
  0xb2   :  { %s1674_s0 = scalar_lea.hbm %s1673_s11, 8  ;;  %s1676_s27 = scalar_lea.hbm %s2023_s5, 8 }
  0xb3   :  { %p1675_p8 = scmp.ne.s32.totalorder %s1673_s11, %s1674_s0  ;;  %p1677_p9 = scmp.lt.s32.totalorder %s1673_s11, %s2023_s5 }
  0xb4   :  { %p1678_p10 = scmp.lt.s32.totalorder %s1676_s27, %s1674_s0 }
  0xb6   :  { %p1679_p11 = por %p1678_p10, %p1677_p9 }
  0xb8   :  { %p1680_p12 = pnand %p1679_p11, %p1675_p8 }
  0xba   :  { %1683 = shalt.err (!%p1680_p12)
}
  0xbb   :  { %86 = dma.hbm_to_vmem [thread:$0]  %s82_s28, 128, %s84_s26, [#allocation5]  }
  0xbc   :  { %s2000_s17 = smov [#allocation8]   ;;  %s133_s19 = sshll.u32 %s2053_s29, 4  ;;  %s134_s19 = int_to_ptr.hbm [resolvable:$true] %s133_s19 }
  0xbd   :  { %s108_s25 = sshll.u32 %s2000_s17, 4  ;;  %s1696_s10 = sshra.s32 %s2244_s3, 4  ;;  %s109_s25 = int_to_ptr.vmem [resolvable:$true] %s108_s25  ;;  %s1697_s10 = int_to_ptr.hbm [resolvable:$true] %s1696_s10 }
  0xbe   :  { %s1698_s15 = scalar_lea.hbm %s1697_s10, 32  ;;  %s1700_s16 = scalar_lea.hbm %s2043_s21, 32 }
  0xbf   :  { %p1699_p13 = scmp.ne.s32.totalorder %s1697_s10, %s1698_s15  ;;  %p1701_p0 = scmp.lt.s32.totalorder %s1697_s10, %s2043_s21 }
  0xc0   :  { %p1702_p1 = scmp.lt.s32.totalorder %s1700_s16, %s1698_s15 }
  0xc2   :  { %p1703_p2 = por %p1702_p1, %p1701_p0 }
  0xc4   :  { %p1704_p3 = pnand %p1703_p2, %p1699_p13 }
  0xc6   :  { %1707 = shalt.err (!%p1704_p3)
}
  0xc7   :  { %114 = dma.hbm_to_vmem [thread:$0]  %s2244_s3, 512, %s109_s25, [#allocation7], %s1989_s2, %s1989_s2, %s1990_s7  }
  0xc8   :  { %s156_s5 = sshll.u32 %s2068_s14, 4  ;;  %s2001_s30 = smov [#allocation11]   ;;  %s2257_s5 = int_to_ptr.hbm [resolvable:$true] %s156_s5 }
  0xc9   :  { %s135_s8 = sshll.u32 %s2001_s30, 4  ;;  %s1720_s18 = sshra.s32 %s134_s19, 4  ;;  %s136_s8 = int_to_ptr.vmem [resolvable:$true] %s135_s8  ;;  %s1721_s18 = int_to_ptr.hbm [resolvable:$true] %s1720_s18 }
  0xca   :  { %s1722_s21 = scalar_lea.hbm %s1721_s18, 1  ;;  %s1724_s22 = scalar_lea.hbm %s2053_s29, 1 }
  0xcb   :  { %p1723_p4 = scmp.ne.s32.totalorder %s1721_s18, %s1722_s21  ;;  %p1725_p5 = scmp.lt.s32.totalorder %s1721_s18, %s2053_s29 }
  0xcc   :  { %p1726_p6 = scmp.lt.s32.totalorder %s1724_s22, %s1722_s21 }
  0xce   :  { %p1727_p7 = por %p1726_p6, %p1725_p5 }
  0xd0   :  { %p1728_p8 = pnand %p1727_p7, %p1723_p4 }
  0xd2   :  { %1731 = shalt.err (!%p1728_p8)
}
  0xd3   :  { %138 = dma.hbm_to_vmem [thread:$0]  %s134_s19, 16, %s136_s8, [#allocation10]  }
  0xd4   :  { %s2002_s2 = smov [#allocation14]   ;;  %s1744_s23 = sshra.s32 %s2257_s5, 4  ;;  %s1745_s23 = int_to_ptr.hbm [resolvable:$true] %s1744_s23 }
  0xd5   :  { %s158_s7 = sshll.u32 %s2002_s2, 4  ;;  %s1746_s28 = scalar_lea.hbm %s1745_s23, 32  ;;  %s159_s7 = int_to_ptr.vmem [resolvable:$true] %s158_s7 }
  0xd6   :  { %p1747_p9 = scmp.ne.s32.totalorder %s1745_s23, %s1746_s28  ;;  %s1748_s13 = scalar_lea.hbm %s2068_s14, 32 }
  0xd7   :  { %p1749_p10 = scmp.lt.s32.totalorder %s1745_s23, %s2068_s14  ;;  %p1750_p11 = scmp.lt.s32.totalorder %s1748_s13, %s1746_s28 }
  0xd9   :  { %p1751_p12 = por %p1750_p11, %p1749_p10 }
  0xdb   :  { %p1752_p13 = pnand %p1751_p12, %p1747_p9 }
  0xdd   :  { %1755 = shalt.err (!%p1752_p13)
}
  0xde   :  { %s2003_s29 = smov 256   ;;  %s2456_s9 = sld [smem:[#allocation50_spill]] }
  0xdf   :  { %s2457_s12 = sld [smem:[#allocation51_spill]]  ;;  %s2004_s3 = smov 16  }
  0xe0   :  { %164 = dma.hbm_to_vmem [thread:$0]  %s2257_s5, 512, %s159_s7, [#allocation13], %s2003_s29, %s2003_s29, %s2004_s3  }
  0xe1   :  { %s2005_s26 = smov [#allocation17]  }
  0xe2   :  { %s183_s11 = sshll.u32 %s2005_s26, 4  ;;  %s184_s11 = int_to_ptr.vmem [resolvable:$true] %s183_s11 }
  0xe4   :  { %s181_s1 = sshll.u32 %s2456_s9, 4  ;;  %s1772_s17 = scalar_lea.hbm %s2456_s9, 8  ;;  %s182_s1 = int_to_ptr.hbm [resolvable:$true] %s181_s1 }
  0xe5   :  { %s205_s0 = sshll.u32 %s2457_s12, 4  ;;  %s1768_s27 = sshra.s32 %s182_s1, 4  ;;  %s1769_s27 = int_to_ptr.hbm [resolvable:$true] %s1768_s27  ;;  %s206_s0 = int_to_ptr.hbm [resolvable:$true] %s205_s0 }
  0xe6   :  { %s1770_s14 = scalar_lea.hbm %s1769_s27, 8  ;;  %p1773_p1 = scmp.lt.s32.totalorder %s1769_s27, %s2456_s9 }
  0xe7   :  { %p1771_p0 = scmp.ne.s32.totalorder %s1769_s27, %s1770_s14  ;;  %p1774_p2 = scmp.lt.s32.totalorder %s1772_s17, %s1770_s14 }
  0xe9   :  { %p1775_p3 = por %p1774_p2, %p1773_p1 }
  0xeb   :  { %p1776_p4 = pnand %p1775_p3, %p1771_p0 }
  0xed   :  { %1779 = shalt.err (!%p1776_p4)
}
  0xee   :  { %186 = dma.hbm_to_vmem [thread:$0]  %s182_s1, 128, %s184_s11, [#allocation16]  }
  0xef   :  { %s2458_s25 = sld [smem:[#allocation52_spill]]  ;;  %s2006_s19 = smov [#allocation20]  }
  0xf0   :  { %s207_s10 = sshll.u32 %s2006_s19, 4  ;;  %s1792_s16 = sshra.s32 %s206_s0, 4  ;;  %s208_s10 = int_to_ptr.vmem [resolvable:$true] %s207_s10  ;;  %s1793_s16 = int_to_ptr.hbm [resolvable:$true] %s1792_s16 }
  0xf1   :  { %s1794_s5 = scalar_lea.hbm %s1793_s16, 1  ;;  %s1796_s30 = scalar_lea.hbm %s2457_s12, 1 }
  0xf2   :  { %p1795_p5 = scmp.ne.s32.totalorder %s1793_s16, %s1794_s5  ;;  %p1797_p6 = scmp.lt.s32.totalorder %s1793_s16, %s2457_s12 }
  0xf3   :  { %p1798_p7 = scmp.lt.s32.totalorder %s1796_s30, %s1794_s5 }
  0xf5   :  { %s229_s15 = sshll.u32 %s2458_s25, 4  ;;  %p1799_p8 = por %p1798_p7, %p1797_p6  ;;  %s230_s15 = int_to_ptr.hbm [resolvable:$true] %s229_s15 }
  0xf7   :  { %p1800_p9 = pnand %p1799_p8, %p1795_p5 }
  0xf9   :  { %1803 = shalt.err (!%p1800_p9)
}
  0xfa   :  { %210 = dma.hbm_to_vmem [thread:$0]  %s206_s0, 16, %s208_s10, [#allocation19]  }
  0xfb   :  { %s2459_s8 = sld [smem:[#allocation53_spill]]  ;;  %s2007_s21 = smov [#allocation23]  }
  0xfc   :  { %s231_s22 = sshll.u32 %s2007_s21, 4  ;;  %s1816_s2 = sshra.s32 %s230_s15, 4  ;;  %s232_s22 = int_to_ptr.vmem [resolvable:$true] %s231_s22  ;;  %s1817_s2 = int_to_ptr.hbm [resolvable:$true] %s1816_s2 }
  0xfd   :  { %s1818_s7 = scalar_lea.hbm %s1817_s2, 1  ;;  %s1820_s23 = scalar_lea.hbm %s2458_s25, 1 }
  0xfe   :  { %p1819_p10 = scmp.ne.s32.totalorder %s1817_s2, %s1818_s7  ;;  %p1821_p11 = scmp.lt.s32.totalorder %s1817_s2, %s2458_s25 }
  0xff   :  { %p1822_p12 = scmp.lt.s32.totalorder %s1820_s23, %s1818_s7 }
 0x101   :  { %s253_s18 = sshll.u32 %s2459_s8, 4  ;;  %p1823_p13 = por %p1822_p12, %p1821_p11  ;;  %s254_s18 = int_to_ptr.hbm [resolvable:$true] %s253_s18 }
 0x103   :  { %p1824_p0 = pnand %p1823_p13, %p1819_p10 }
 0x105   :  { %1827 = shalt.err (!%p1824_p0)
}
 0x106   :  { %234 = dma.hbm_to_vmem [thread:$0]  %s230_s15, 16, %s232_s22, [#allocation22]  }
 0x107   :  { %s2460_s28 = sld [smem:[#allocation54_spill]]  ;;  %s2008_s13 = smov [#allocation26]  }
 0x108   :  { %s255_s29 = sshll.u32 %s2008_s13, 4  ;;  %s1840_s12 = sshra.s32 %s254_s18, 4  ;;  %s256_s29 = int_to_ptr.vmem [resolvable:$true] %s255_s29  ;;  %s1841_s12 = int_to_ptr.hbm [resolvable:$true] %s1840_s12 }
 0x109   :  { %s1842_s3 = scalar_lea.hbm %s1841_s12, 1  ;;  %s1844_s1 = scalar_lea.hbm %s2459_s8, 1 }
 0x10a   :  { %p1843_p1 = scmp.ne.s32.totalorder %s1841_s12, %s1842_s3  ;;  %p1845_p2 = scmp.lt.s32.totalorder %s1841_s12, %s2459_s8 }
 0x10b   :  { %p1846_p3 = scmp.lt.s32.totalorder %s1844_s1, %s1842_s3 }
 0x10d   :  { %s277_s9 = sshll.u32 %s2460_s28, 4  ;;  %p1847_p4 = por %p1846_p3, %p1845_p2  ;;  %s278_s9 = int_to_ptr.hbm [resolvable:$true] %s277_s9 }
 0x10f   :  { %p1848_p5 = pnand %p1847_p4, %p1843_p1 }
 0x111   :  { %1851 = shalt.err (!%p1848_p5)
}
 0x112   :  { %258 = dma.hbm_to_vmem [thread:$0]  %s254_s18, 16, %s256_s29, [#allocation25]  }
 0x113   :  { %s2461_s26 = sld [smem:[#allocation55_spill]]  ;;  %s2009_s0 = smov [#allocation29]  }
 0x114   :  { %s279_s27 = sshll.u32 %s2009_s0, 4  ;;  %s1864_s14 = sshra.s32 %s278_s9, 4  ;;  %s280_s27 = int_to_ptr.vmem [resolvable:$true] %s279_s27  ;;  %s1865_s14 = int_to_ptr.hbm [resolvable:$true] %s1864_s14 }
 0x115   :  { %s1866_s17 = scalar_lea.hbm %s1865_s14, 1  ;;  %s1868_s25 = scalar_lea.hbm %s2460_s28, 1 }
 0x116   :  { %p1867_p6 = scmp.ne.s32.totalorder %s1865_s14, %s1866_s17  ;;  %p1869_p7 = scmp.lt.s32.totalorder %s1865_s14, %s2460_s28 }
 0x117   :  { %p1870_p8 = scmp.lt.s32.totalorder %s1868_s25, %s1866_s17 }
 0x119   :  { %s301_s11 = sshll.u32 %s2461_s26, 4  ;;  %p1871_p9 = por %p1870_p8, %p1869_p7  ;;  %s302_s11 = int_to_ptr.hbm [resolvable:$true] %s301_s11 }
 0x11b   :  { %p1872_p10 = pnand %p1871_p9, %p1867_p6 }
 0x11d   :  { %1875 = shalt.err (!%p1872_p10)
}
 0x11e   :  { %282 = dma.hbm_to_vmem [thread:$0]  %s278_s9, 16, %s280_s27, [#allocation28]  }
 0x11f   :  { %s2462_s19 = sld [smem:[#allocation58_spill]]  ;;  %s2010_s10 = smov [#allocation32]  }
 0x120   :  { %s303_s15 = sshll.u32 %s2010_s10, 4  ;;  %s1888_s5 = sshra.s32 %s302_s11, 4  ;;  %s304_s15 = int_to_ptr.vmem [resolvable:$true] %s303_s15  ;;  %s1889_s5 = int_to_ptr.hbm [resolvable:$true] %s1888_s5 }
 0x121   :  { %s1890_s30 = scalar_lea.hbm %s1889_s5, 1  ;;  %s1892_s8 = scalar_lea.hbm %s2461_s26, 1 }
 0x122   :  { %p1891_p11 = scmp.ne.s32.totalorder %s1889_s5, %s1890_s30  ;;  %p1893_p12 = scmp.lt.s32.totalorder %s1889_s5, %s2461_s26 }
 0x123   :  { %p1894_p13 = scmp.lt.s32.totalorder %s1892_s8, %s1890_s30 }
 0x125   :  { %s327_s16 = sshll.u32 %s2462_s19, 4  ;;  %p1895_p0 = por %p1894_p13, %p1893_p12  ;;  %s328_s16 = int_to_ptr.hbm [resolvable:$true] %s327_s16 }
 0x127   :  { %p1896_p1 = pnand %p1895_p0, %p1891_p11 }
 0x129   :  { %1899 = shalt.err (!%p1896_p1)
}
 0x12a   :  { %306 = dma.hbm_to_vmem [thread:$0]  %s302_s11, 16, %s304_s15, [#allocation31]  }
 0x12b   :  { %s2011_s18 = smov [#allocation35]   ;;  %s1912_s22 = sshra.s32 %s328_s16, 4  ;;  %s1913_s22 = int_to_ptr.hbm [resolvable:$true] %s1912_s22 }
 0x12c   :  { %s329_s21 = sshll.u32 %s2011_s18, 4  ;;  %s1914_s2 = scalar_lea.hbm %s1913_s22, 1  ;;  %s330_s21 = int_to_ptr.vmem [resolvable:$true] %s329_s21 }
 0x12d   :  { %p1915_p2 = scmp.ne.s32.totalorder %s1913_s22, %s1914_s2  ;;  %s1916_s7 = scalar_lea.hbm %s2462_s19, 1 }
 0x12e   :  { %p1917_p3 = scmp.lt.s32.totalorder %s1913_s22, %s2462_s19  ;;  %p1918_p4 = scmp.lt.s32.totalorder %s1916_s7, %s1914_s2 }
 0x130   :  { %p1919_p5 = por %p1918_p4, %p1917_p3 }
 0x132   :  { %p1920_p6 = pnand %p1919_p5, %p1915_p2 }
 0x134   :  { %1923 = shalt.err (!%p1920_p6)
}
 0x135   :  { %332 = dma.hbm_to_vmem [thread:$0]  %s328_s16, 16, %s330_s21, [#allocation34]  }
 0x136   :  { %1936 = dma.done.wait [#allocation5], 128  }
 0x137   :  { %1937 = vsyncadd [#allocation5], 4294967168 }
 0x138   :  { %1938 = dma.done.wait [#allocation7], 640  }
 0x139   :  { %1939 = vsyncadd [#allocation7], 4294966656 }
 0x13a   :  { %1940 = dma.done.wait [#allocation10], 528  }
 0x13b   :  { %1941 = vsyncadd [#allocation10], 4294966768 }
 0x13c   :  { %1942 = dma.done.wait [#allocation13], 528  }
 0x13d   :  { %1943 = vsyncadd [#allocation13], 4294966768 }
 0x13e   :  { %1944 = dma.done.wait [#allocation16], 160  }
 0x13f   :  { %1945 = vsyncadd [#allocation16], 4294967136 }
 0x140   :  { %1946 = dma.done.wait [#allocation19], 2064  }
 0x141   :  { %1947 = vsyncadd [#allocation19], 4294965232 }
 0x142   :  { %1948 = dma.done.wait [#allocation22], 2064  }
 0x143   :  { %1949 = vsyncadd [#allocation22], 4294965232 }
 0x144   :  { %1950 = dma.done.wait [#allocation25], 2064  }
 0x145   :  { %1951 = vsyncadd [#allocation25], 4294965232 }
 0x146   :  { %1952 = dma.done.wait [#allocation28], 2064  }
 0x147   :  { %1953 = vsyncadd [#allocation28], 4294965232 }
 0x148   :  { %1954 = dma.done.wait [#allocation31], 2064  }
 0x149   :  { %1955 = vsyncadd [#allocation31], 4294965232 }
 0x14a   :  { %1956 = dma.done.wait [#allocation34], 32  }
 0x14b   :  { %1957 = vsyncadd [#allocation34], 4294967264  ;;  %s2463_s23 = sld [smem:[#allocation47_spill]]  ;;  %v426_v0 = vld [vmem:[#allocation8 + $0x18] sm:$0xff]  ;;  %v425_v2 = vld [vmem:[#allocation8 + $0x10] sm:$0xff]  ;;  %vm431_vm0 = vcmask 261120  }
 0x14c   :  { %v458_v1 = vld [vmem:[#allocation9 + $0x18] sm:$0xff]  ;;  %447 = vmatpush.msra.mxu0 %v426_v0  ;;  %v457_v3 = vld [vmem:[#allocation9 + $0x10] sm:$0xff]  ;;  %v424_v4 = vld [vmem:[#allocation8 + $0x8] sm:$0xff]  ;;  %s2012_s28 = smov 64   ;;  %s2464_s13 = sld [smem:[#allocation57_spill]]  ;;  %vm667_vm5 = vcmask 1043456  }
 0x14d   :  { %478 = vmatpush.msra.mxu1 %v458_v1  ;;  %v456_v5 = vld [vmem:[#allocation9 + $0x8] sm:$0xff]  ;;  %v423_v6 = vld [vmem:[#allocation8] sm:$0xff]  ;;  %v421_v8 = vld [vmem:[#allocation4] sm:$0xff]  ;;  %s2465_s29 = sld [smem:[#allocation48_spill]]  ;;  %vm651_vm6 = vcmask 97280   ;;  %s2013_s9 = smov 96  }
 0x14e   :  { %v455_v7 = vld [vmem:[#allocation9] sm:$0xff]  ;;  %448 = vmatpush.msra.mxu0 %v425_v2  ;;  %s2014_s12 = smov 32   ;;  %s2466_s3 = sld [smem:[#allocation49_spill]]  ;;  %v711_v42 = vld [vmem:[%s2153_s20 + $0x18] sm:$0xff]  ;;  %v710_v43 = vld [vmem:[%s2153_s20 + $0x10] sm:$0xff]  ;;  %vm546_vm7 = vcmask 130048  }
 0x14f   :  { %479 = vmatpush.msra.mxu1 %v457_v3  ;;  %v1417_v10 = vld [vmem:[#allocation12] ss:$0 sm:$0xff]  ;;  %v1416_v13 = vld [vmem:[#allocation11] ss:$0 sm:$0xff]  ;;  %v544_v45 = vld [vmem:[#allocation14 + $0x10] sm:$0xff]  ;;  %vm1194_vm8 = vcmask 128000  }
 0x150   :  { %449 = vmatpush.msra.mxu0 %v424_v4  ;;  %v709_v44 = vld [vmem:[%s2153_s20 + $0x8] sm:$0xff]  ;;  %564 = vmatpush.msra.mxu2 %v544_v45  ;;  %v543_v48 = vld [vmem:[#allocation14 + $0x8] sm:$0xff]  ;;  %v533_v49 = vld [vmem:[#allocation6] sm:$0xff]  ;;  %vm1199_vm9 = vcmask 130054   ;;  %vm1201_vm10 = vcmask 125952   ;;  %vm1208_vm11 = vcmask 130052  }
 0x151   :  { %v422_v9 = vld [vmem:[%s2463_s23] sm:$0xff]  ;;  %480 = vmatpush.msra.mxu1 %v456_v5  ;;  %v542_v47 = vld [vmem:[#allocation14] sm:$0xff]  ;;  %vm1205_vm12 = vcmask 123904   ;;  %vm1214_vm13 = vcmask 130050   ;;  %vm1222_vm14 = vcmask 122880   ;;  %vm1227_vm15 = vcmask 128001  }
 0x152   :  { %450 = vmatpush.msra.mxu0 %v423_v6  ;;  %v646_v32 = vld [vmem:[%s2464_s13 + $0x8] sm:$0xf]  ;;  %v645_v33 = vld [vmem:[%s2464_s13] sm:$0xff]  ;;  %565 = vmatpush.msra.mxu2 %v542_v47  ;;  %v849_v45 = vld [vmem:[#allocation18 + $0x18] sm:$0xff] }
 0x153   :  { %481 = vmatpush.msra.mxu1 %v455_v7  ;;  %1287 = vmatmul.msk.f32.vlgmr.msra.gmra.mxu0 %vm431_vm0, %v421_v8  ;;  %v640_v34 = vld [vmem:[%s2465_s29] sm:$0xff]  ;;  %v641_v35 = vld [vmem:[%s2465_s29 + $0x8] sm:$0xff]  ;;  %v642_v38 = vld [vmem:[%s2465_s29 + $0x10] sm:$0xff] }
 0x154   :  { %1288 = vmatmul.msk.f32.vlgmr.msra.gmra.mxu1 %vm431_vm0, %v422_v9  ;;  %1294 = vmatpush.msk.msrb.mxu0 %vm667_vm5, %v646_v32  ;;  %v643_v40 = vld [vmem:[%s2465_s29 + $0x18] sm:$0xff]  ;;  %v644_v41 = vld [vmem:[%s2465_s29 + $0x20] sm:$0xff]  ;;  %v540_v51 = vld [vmem:[%s2466_s3 + $0x30] sm:$0xff]  ;;  %vm1216_vm5 = vcmask 130055  }
 0x155   :  { %743 = vmatpush.msrb.mxu1 %v711_v42  ;;  %v545_v46 = vld [vmem:[#allocation14 + $0x18] sm:$0xff]  ;;  %v541_v52 = vld [vmem:[%s2466_s3 + $0x38] sm:$0xff]  ;;  %1290 = vmatmul.msk.f32.vlgmr.msra.gmra.mxu2 %vm546_vm7, %v533_v49  ;;  %v1418_v54 = vld [vmem:[#allocation35] ss:$0 sm:$0xff] }
 0x156   :  { %686 = vmatpush.msrb.mxu0 %v645_v33  ;;  %584 = vmatpush.msra.mxu3 %v545_v46  ;;  %v708_v50 = vld [vmem:[%s2153_s20] sm:$0xff]  ;;  %v539_v55 = vld [vmem:[%s2466_s3 + $0x28] sm:$0xff]  ;;  %v536_v56 = vld [vmem:[%s2466_s3 + $0x10] sm:$0xff] }
 0x157   :  { %744 = vmatpush.msrb.mxu1 %v710_v43  ;;  %v538_v53 = vld [vmem:[%s2466_s3 + $0x20] sm:$0xff]  ;;  %604 = vmatpush.msrb.mxu2 %v540_v51  ;;  %v537_v57 = vld [vmem:[%s2466_s3 + $0x18] sm:$0xff]  ;;  %v535_v61 = vld [vmem:[%s2466_s3 + $0x8] sm:$0xff] }
 0x158   :  { %585 = vmatpush.msra.mxu3 %v543_v48  ;;  %v534_v59 = vld [vmem:[%s2466_s3] sm:$0xff]  ;;  %v854_v33 = vld [vmem:[#allocation18 + $0x40] sm:$0xff]  ;;  %v1030_v48 = vld [vmem:[#allocation27 + $0x10] sm:$0xff] }
 0x159   :  { %745 = vmatpush.msrb.mxu1 %v709_v44  ;;  %1291 = vmatmul.msk.f32.vlgmr.msra.gmra.mxu3 %vm546_vm7, %v533_v49  ;;  %v1037_v32 = vld [vmem:[#allocation27 + $0x48] sm:$0xff]  ;;  %v850_v42 = vld [vmem:[#allocation18 + $0x20] sm:$0xff] }
 0x15a   :  { %624 = vmatpush.msrb.mxu3 %v541_v52  ;;  %605 = vmatpush.msrb.mxu2 %v538_v53  ;;  %v1032_v43 = vld [vmem:[#allocation27 + $0x20] sm:$0xff]  ;;  %v1031_v46 = vld [vmem:[#allocation27 + $0x18] sm:$0xff]  ;;  %v848_v47 = vld [vmem:[#allocation18 + $0x10] sm:$0xff] }
 0x15b   :  { %1295 = vmatmul.msk.f32.vlgmr.msrb.gmra.mxu0 %vm651_vm6, %v640_v34  ;;  %746 = vmatpush.msrb.mxu1 %v708_v50  ;;  %v1036_v34 = vld [vmem:[#allocation27 + $0x40] sm:$0xff]  ;;  %v1029_v50 = vld [vmem:[#allocation27 + $0x8] sm:$0xff] }
 0x15c   :  { %625 = vmatpush.msrb.mxu3 %v539_v55  ;;  %606 = vmatpush.msrb.mxu2 %v536_v56  ;;  %v847_v49 = vld [vmem:[#allocation18 + $0x8] sm:$0xff]  ;;  %v846_v53 = vld [vmem:[#allocation18] sm:$0xff]  ;;  %v632_v56 = vld [vmem:[#allocation15] sm:$0x3] }
 0x15e   :  { %626 = vmatpush.msrb.mxu3 %v537_v57  ;;  %607 = vmatpush.msrb.mxu2 %v534_v59  ;;  %v634_v57 = vperm.slane %v632_v56, 0 }
 0x160   :  { %627 = vmatpush.msrb.mxu3 %v535_v61  ;;  %v1419_v61 = vld [vmem:[%s2158_s24] ss:$0 sm:$0xff]  ;;  %s2467_s24 = sld [smem:[#allocation56_spill]] }
 0x163   :  { %1296 = vmatmul.msk.f32.gmra.mxu0 %vm651_vm6, %v641_v35 }
 0x16b   :  { %1297 = vmatmul.msk.f32.gmra.mxu0 %vm651_vm6, %v642_v38  ;;  %v852_v38 = vld [vmem:[#allocation18 + $0x30] sm:$0xff] }
 0x173   :  { %1298 = vmatmul.msk.f32.gmra.mxu0 %vm651_vm6, %v643_v40  ;;  %v851_v40 = vld [vmem:[#allocation18 + $0x28] sm:$0xff] }
 0x17b   :  { %1299 = vmatmul.msk.f32.gmra.mxu0 %vm651_vm6, %v644_v41  ;;  %v1033_v41 = vld [vmem:[#allocation27 + $0x28] sm:$0xff] }
 0x1d0   :  { %v452_v14 = vpop.f32.mrf.mxu0 }
 0x1d1   :  { %v483_v11 = vpop.f32.mrf.mxu1  ;;  %v453_v15 = vadd.f32 %v1416_v13, %v452_v14 }
 0x1d2   :  { %v484_v12 = vadd.f32 %v1417_v10, %v483_v11 }
 0x1d4   :  { %507 = vrot.lane.b32.xlu0 %v484_v12, %s2012_s28  ;;  %v486_v16 = vadd.f32 %v484_v12, %v453_v15 }
 0x1d6   :  { %v1289_v17 = vmul.f32 -1.442695, %v486_v16 }
 0x1d8   :  { %1426 = vpow2.f32 %v1289_v17  ;;  %v688_v58 = vpop.f32.mrf.mxu0  ;;  %v567_v51 = vpop.f32.mrf.mxu2 }
 0x1d9   :  { %v689_v60 = vadd.f32 %v1418_v54, %v688_v58  ;;  %v635_v58 = vperm.slane %v632_v56, 1 }
 0x1db   :  { %v703_v62 = vmax.f32 %v689_v60, 0.0 }
 0x1dc   :  { %v587_v52 = vpop.f32.mrf.mxu3 }
 0x1dd   :  { %1300 = vmatmul.msk.f32.vlgmr.msrb.gmra.mxu1 %vm431_vm0, %v703_v62 }
 0x1de   :  { %v1427_v18 = vpop.eup %1426 }
 0x1df   :  { %v490_v19 = vadd.f32 1.0, %v1427_v18  ;;  %v861_v18 = vld [vmem:[#allocation18 + $0x78] sm:$0xff] }
 0x1e0   :  { %v691_v63 = vpop.f32.mrf.mxu0  ;;  %866 = vmatpush.msra.mxu2 %v861_v18 }
 0x1e1   :  { %1428 = vrcp.f32 %v490_v19  ;;  %v502_v25 = vand.u32 2147483648, %v490_v19  ;;  %vm496_vm2 = vweird.f32 %v490_v19  ;;  %v500_v26 = vand.u32 2147483647, %v490_v19 }
 0x1e2   :  { %v692_v1 = vadd.f32 %v1418_v54, %v691_v63 }
 0x1e3   :  { %v503_v28 = vor.u32 1.1754944e-38, %v502_v25  ;;  %vm501_vm4 = vcmp.eq.f32.partialorder %v500_v26, 8.507059e+37  ;;  %v1040_v25 = vld [vmem:[#allocation27 + $0x60] sm:$0xff]  ;;  %v857_v26 = vld [vmem:[#allocation18 + $0x58] sm:$0xff] }
 0x1e4   :  { %v704_v2 = vmax.f32 %v692_v1, 0.0 }
 0x1e6   :  { %1301 = vmatmul.msk.f32.gmra.mxu1 %vm431_vm0, %v704_v2  ;;  %v2334_v2 = vld [vmem:[#allocation17] sm:$0x3f] }
 0x1e7   :  { %v1429_v20 = vpop.eup %1428 }
 0x1e8   :  { %v492_v21 = vmul.f32 %v1429_v20, %v490_v19  ;;  %vm497_vm1 = vweird.f32 %v1429_v20  ;;  %v694_v4 = vpop.f32.mrf.mxu0  ;;  %v1043_v19 = vld [vmem:[#allocation27 + $0x78] sm:$0xff] }
 0x1e9   :  { %vm498_vm3 = vmor %vm496_vm2, %vm497_vm1  ;;  %v695_v6 = vadd.f32 %v1418_v54, %v694_v4  ;;  %1048 = vmatpush.msra.mxu1 %v1043_v19  ;;  %vm1237_vm1 = vcmask 130051   ;;  %vm1196_vm2 = vcmask 126976  }
 0x1ea   :  { %v493_v22 = vsub.f32 1.0, %v492_v21  ;;  %v1042_v21 = vld [vmem:[#allocation27 + $0x70] sm:$0xff] }
 0x1eb   :  { %1049 = vmatpush.msra.mxu1 %v1042_v21 }
 0x1ec   :  { %v494_v23 = vmul.f32 %v1429_v20, %v493_v22  ;;  %v859_v22 = vld [vmem:[#allocation18 + $0x68] sm:$0xff] }
 0x1ee   :  { %v495_v24 = vadd.f32 %v1429_v20, %v494_v23  ;;  %v1041_v23 = vld [vmem:[#allocation27 + $0x68] sm:$0xff] }
 0x1ef   :  { %1050 = vmatpush.msra.mxu1 %v1041_v23 }
 0x1f0   :  { %v499_v27 = vsel %vm498_vm3, %v1429_v20, %v495_v24  ;;  %v697_v11 = vpop.f32.mrf.mxu0  ;;  %v860_v20 = vld [vmem:[#allocation18 + $0x70] sm:$0xff]  ;;  %v858_v24 = vld [vmem:[#allocation18 + $0x60] sm:$0xff]  ;;  %vm1203_vm3 = vcmask 130053  }
 0x1f1   :  { %v2289_v30 = vsel %vm501_vm4, %v503_v28, %v499_v27  ;;  %v698_v12 = vadd.f32 %v1418_v54, %v697_v11  ;;  %867 = vmatpush.msra.mxu2 %v860_v20  ;;  %1051 = vmatpush.msra.mxu1 %v1040_v25  ;;  %v1039_v27 = vld [vmem:[#allocation27 + $0x58] sm:$0xff]  ;;  %v856_v28 = vld [vmem:[#allocation18 + $0x50] sm:$0xff]  ;;  %vm1211_vm4 = vcmask 129026  }
 0x1f2   :  { %v517_v3 = vsub.f32 1.0, %v2289_v30 }
 0x1f3   :  { %v706_v13 = vmax.f32 %v698_v12, 0.0  ;;  %868 = vmatpush.msra.mxu2 %v859_v22  ;;  %1052 = vmatpush.msra.mxu1 %v1039_v27 }
 0x1f5   :  { %869 = vmatpush.msra.mxu2 %v858_v24 }
 0x1f7   :  { %870 = vmatpush.msra.mxu2 %v857_v26 }
 0x1f8   :  { %v700_v14 = vpop.f32.mrf.mxu0 }
 0x1f9   :  { %871 = vmatpush.msra.mxu2 %v856_v28 }
 0x246   :  { %v508_v29 = vpop.permute.xlu0 %507 }
 0x247   :  { %v510_v31 = vmul.f32 %v508_v29, %v2289_v30  ;;  %v1038_v29 = vld [vmem:[#allocation27 + $0x50] sm:$0xff] }
 0x248   :  { %1053 = vmatpush.msra.mxu1 %v1038_v29 }
 0x249   :  { %512 = vrot.lane.b32.xlu0 %v510_v31, %s2012_s28  ;;  %v855_v31 = vld [vmem:[#allocation18 + $0x48] sm:$0xff] }
 0x24a   :  { %872 = vmatpush.msra.mxu2 %v855_v31  ;;  %1054 = vmatpush.msra.mxu1 %v1037_v32 }
 0x24c   :  { %873 = vmatpush.msra.mxu2 %v854_v33  ;;  %1055 = vmatpush.msra.mxu1 %v1036_v34 }
 0x2bb   :  { %v513_v36 = vpop.permute.xlu0 %512 }
 0x2bc   :  { %v515_v37 = vadd.f32 %v513_v36, %v453_v15  ;;  %v701_v15 = vadd.f32 %v1418_v54, %v700_v14  ;;  %v853_v36 = vld [vmem:[#allocation18 + $0x38] sm:$0xff]  ;;  %v1028_v54 = vld [vmem:[#allocation27] sm:$0xff] }
 0x2bd   :  { %874 = vmatpush.msra.mxu2 %v853_v36 }
 0x2be   :  { %1430 = vtanh.f32 %v515_v37  ;;  %v707_v16 = vmax.f32 %v701_v15, 0.0  ;;  %v1035_v37 = vld [vmem:[#allocation27 + $0x38] sm:$0xff] }
 0x2bf   :  { %1056 = vmatpush.msra.mxu1 %v1035_v37  ;;  %875 = vmatpush.msra.mxu2 %v852_v38 }
 0x2c1   :  { %876 = vmatpush.msra.mxu2 %v851_v40 }
 0x2c3   :  { %877 = vmatpush.msra.mxu2 %v850_v42 }
 0x2c4   :  { %v1431_v39 = vpop.eup %1430 }
 0x2c5   :  { %519 = vrot.lane.b32.xlu1 %v1431_v39, %s2013_s9  ;;  %v1034_v39 = vld [vmem:[#allocation27 + $0x30] sm:$0xff]  ;;  %878 = vmatpush.msra.mxu2 %v849_v45 }
 0x2c6   :  { %1057 = vmatpush.msra.mxu1 %v1034_v39 }
 0x2c7   :  { %879 = vmatpush.msra.mxu2 %v848_v47 }
 0x2c8   :  { %1058 = vmatpush.msra.mxu1 %v1033_v41 }
 0x2c9   :  { %880 = vmatpush.msra.mxu2 %v847_v49 }
 0x2ca   :  { %1059 = vmatpush.msra.mxu1 %v1032_v43 }
 0x2cb   :  { %881 = vmatpush.msra.mxu2 %v846_v53 }
 0x2cc   :  { %1060 = vmatpush.msra.mxu1 %v1031_v46 }
 0x2cd   :  { %523 = vrot.lane.b32.xlu1 %v422_v9, %s2014_s12  ;;  %v705_v9 = vmax.f32 %v695_v6, 0.0 }
 0x2ce   :  { %1061 = vmatpush.msra.mxu1 %v1030_v48 }
 0x2cf   :  { %1302 = vmatmul.msk.f32.gmra.mxu1 %vm431_vm0, %v705_v9 }
 0x2d0   :  { %1062 = vmatpush.msra.mxu1 %v1029_v50 }
 0x2d2   :  { %1063 = vmatpush.msra.mxu1 %v1028_v54 }
 0x2d7   :  { %1303 = vmatmul.msk.f32.gmra.mxu1 %vm431_vm0, %v706_v13 }
 0x2df   :  { %1304 = vmatmul.msk.f32.gmra.mxu1 %vm431_vm0, %v707_v16 }
 0x337   :  { %v520_v0 = vpop.permute.xlu1 %519 }
 0x338   :  { %v522_v7 = vmul.f32 %v520_v0, %v517_v3 }
 0x33f   :  { %v524_v5 = vpop.permute.xlu1 %523 }
 0x340   :  { %v526_v8 = vmul.f32 %v524_v5, %v2289_v30  ;;  %v748_v30 = vpop.f32.mrf.mxu1 }
 0x341   :  { %v749_v3 = vadd.f32 %v1419_v61, %v748_v30 }
 0x342   :  { %v527_v10 = vadd.f32 %v526_v8, %v522_v7 }
 0x344   :  { %529 = vrot.lane.b32.xlu2 %v527_v10, %s2013_s9 }
 0x348   :  { %v751_v35 = vpop.f32.mrf.mxu1 }
 0x349   :  { %v752_v7 = vadd.f32 %v1419_v61, %v751_v35 }
 0x350   :  { %v754_v44 = vpop.f32.mrf.mxu1 }
 0x351   :  { %v755_v8 = vadd.f32 %v1419_v61, %v754_v44 }
 0x358   :  { %v757_v55 = vpop.f32.mrf.mxu1 }
 0x359   :  { %v758_v9 = vadd.f32 %v1419_v61, %v757_v55 }
 0x360   :  { %v760_v6 = vpop.f32.mrf.mxu1 }
 0x361   :  { %v761_v18 = vadd.f32 %v1419_v61, %v760_v6  ;;  %v1099_v6 = vld [vmem:[#allocation30 + $0x70] sm:$0xff] }
 0x39e   :  { %v530_v17 = vpop.permute.xlu2 %529 }
 0x39f   :  { %532 = vst.msk [vmem:[%s2163_s6] sm:$0xff] %vm431_vm0, %v530_v17  ;;  %1292 = vmatmul.msk.f32.vlgmr.msrb.gmra.mxu2 %vm431_vm0, %v530_v17  ;;  %1293 = vmatmul.msk.f32.vlgmr.msrb.gmra.mxu3 %vm431_vm0, %v530_v17  ;;  %vm1233_vm0 = vcmask 124928  }
 0x422   :  { %v609_v59 = vpop.f32.mrf.mxu2  ;;  %v629_v60 = vpop.f32.mrf.mxu3 }
 0x423   :  { %v610_v62 = vadd.f32 %v609_v59, %v567_v51  ;;  %v630_v63 = vadd.f32 %v629_v60, %v587_v52 }
 0x425   :  { %v2330_v0 = vadd.f32 %v634_v57, %v610_v62  ;;  %v2332_v1 = vadd.f32 %v635_v58, %v630_v63 }
 0x427   :  { %v764_v4 = vperm.slane %v2330_v0, 0  ;;  %v772_v5 = vperm.slane %v2330_v0, 1  ;;  %v783_v10 = vperm.slane %v2330_v0, 2  ;;  %v768_v13 = vperm.slane %v2332_v1, 0 }
 0x428   :  { %v776_v14 = vperm.slane %v2332_v1, 1  ;;  %v791_v15 = vperm.slane %v2330_v0, 3  ;;  %v787_v16 = vperm.slane %v2332_v1, 2  ;;  %v795_v17 = vperm.slane %v2332_v1, 3 }
 0x429   :  { %v765_v11 = vadd.f32 %v764_v4, %v2334_v2  ;;  %v773_v12 = vadd.f32 %v772_v5, %v2334_v2  ;;  %v769_v21 = vadd.f32 %v768_v13, %v749_v3  ;;  %v806_v23 = vperm.slane %v2332_v1, 4  ;;  %v1100_v5 = vld [vmem:[#allocation30 + $0x78] sm:$0xff] }
 0x42a   :  { %v777_v22 = vadd.f32 %v776_v14, %v749_v3  ;;  %v825_v24 = vperm.slane %v2332_v1, 6  ;;  %v836_v25 = vperm.slane %v2332_v1, 7  ;;  %v784_v26 = vadd.f32 %v783_v10, %v2334_v2  ;;  %1105 = vmatpush.msrb.mxu1 %v1100_v5  ;;  %1327 = vmatpush.msrb.mxu2 %v1100_v5  ;;  %v920_v10 = vld [vmem:[#allocation21 + $0x68] sm:$0xff]  ;;  %v1096_v13 = vld [vmem:[#allocation30 + $0x58] sm:$0xff] }
 0x42b   :  { %v766_v19 = vmax.f32 %v765_v11, 0.0  ;;  %v774_v20 = vmax.f32 %v773_v12, 0.0  ;;  %v770_v27 = vmax.f32 %v769_v21, 0.0  ;;  %v778_v29 = vadd.f32 %v776_v14, %v752_v7  ;;  %v1097_v11 = vld [vmem:[#allocation30 + $0x60] sm:$0xff] }
 0x42c   :  { %v779_v28 = vmax.f32 %v777_v22, 0.0  ;;  %v788_v30 = vadd.f32 %v787_v16, %v752_v7  ;;  %v826_v31 = vadd.f32 %v825_v24, %v758_v9  ;;  %v827_v32 = vadd.f32 %v825_v24, %v761_v18  ;;  %1106 = vmatpush.msrb.mxu1 %v1099_v6  ;;  %1328 = vmatpush.msrb.mxu2 %v1099_v6  ;;  %v919_v12 = vld [vmem:[#allocation21 + $0x60] sm:$0xff]  ;;  %v1095_v16 = vld [vmem:[#allocation30 + $0x50] sm:$0xff] }
 0x42d   :  { %767 = vst [vmem:[#allocation2] sm:$0x3f] %v766_v19  ;;  %v837_v33 = vadd.f32 %v836_v25, %v761_v18  ;;  %v785_v34 = vmax.f32 %v784_v26, 0.0  ;;  %v802_v35 = vperm.slane %v2330_v0, 4  ;;  %v813_v36 = vperm.slane %v2330_v0, 5  ;;  %v917_v18 = vld [vmem:[#allocation21 + $0x50] sm:$0xff] }
 0x42e   :  { %775 = vst [vmem:[#allocation2 + $0x6] sm:$0x3f] %v774_v20  ;;  %v796_v37 = vadd.f32 %v795_v17, %v752_v7  ;;  %v828_v38 = vmax.f32 %v826_v31, 0.0  ;;  %v829_v39 = vmax.f32 %v827_v32, 0.0  ;;  %v792_v41 = vadd.f32 %v791_v15, %v2334_v2  ;;  %v918_v15 = vld [vmem:[#allocation21 + $0x58] sm:$0xff]  ;;  %v1094_v19 = vld [vmem:[#allocation30 + $0x48] sm:$0xff] }
 0x42f   :  { %771 = vst [vmem:[#allocation3 + $0x8] sm:$0x1f] %v770_v27  ;;  %v838_v40 = vmax.f32 %v837_v33, 0.0  ;;  %v780_v42 = vmax.f32 %v778_v29, 0.0  ;;  %v797_v43 = vadd.f32 %v795_v17, %v755_v8  ;;  %v817_v44 = vperm.slane %v2332_v1, 5  ;;  %v916_v20 = vld [vmem:[#allocation21 + $0x48] sm:$0xff] }
 0x430   :  { %781 = vst [vmem:[#allocation3 + $0x8] sm:$0xe0] %v779_v28  ;;  %v789_v45 = vmax.f32 %v788_v30, 0.0  ;;  %v807_v46 = vadd.f32 %v806_v23, %v755_v8  ;;  %v821_v47 = vperm.slane %v2330_v0, 6  ;;  %v798_v48 = vmax.f32 %v796_v37, 0.0  ;;  %v922_v8 = vld [vmem:[#allocation21 + $0x78] sm:$0xff] }
 0x431   :  { %786 = vst [vmem:[#allocation2 + $0xc] sm:$0x3f] %v785_v34  ;;  %v803_v49 = vadd.f32 %v802_v35, %v2334_v2  ;;  %v832_v50 = vperm.slane %v2330_v0, 7  ;;  %v793_v51 = vmax.f32 %v792_v41, 0.0  ;;  %v814_v52 = vadd.f32 %v813_v36, %v2334_v2  ;;  %927 = vmatpush.msra.mxu3 %v922_v8  ;;  %v1093_v21 = vld [vmem:[#allocation30 + $0x40] sm:$0xff]  ;;  %v914_v25 = vld [vmem:[#allocation21 + $0x38] sm:$0xff] }
 0x432   :  { %830 = vst [vmem:[#allocation3 + $0x10] sm:$0xc0] %v828_v38  ;;  %v799_v54 = vmax.f32 %v797_v43, 0.0  ;;  %v808_v55 = vadd.f32 %v806_v23, %v758_v9  ;;  %v809_v56 = vmax.f32 %v807_v46, 0.0  ;;  %v818_v57 = vadd.f32 %v817_v44, %v758_v9  ;;  %v921_v9 = vld [vmem:[#allocation21 + $0x70] sm:$0xff]  ;;  %v915_v22 = vld [vmem:[#allocation21 + $0x40] sm:$0xff] }
 0x433   :  { %831 = vst [vmem:[#allocation3 + $0x18] sm:$0x7] %v829_v39  ;;  %v804_v59 = vmax.f32 %v803_v49, 0.0  ;;  %v822_v60 = vadd.f32 %v821_v47, %v2334_v2  ;;  %v815_v61 = vmax.f32 %v814_v52, 0.0  ;;  %v833_v62 = vadd.f32 %v832_v50, %v2334_v2  ;;  %v1098_v2 = vld [vmem:[#allocation30 + $0x68] sm:$0xff]  ;;  %928 = vmatpush.msra.mxu3 %v921_v9  ;;  %v1092_v23 = vld [vmem:[#allocation30 + $0x38] sm:$0xff] }
 0x434   :  { %839 = vst [vmem:[#allocation3 + $0x18] sm:$0xf8] %v838_v40  ;;  %v810_v63 = vmax.f32 %v808_v55, 0.0  ;;  %v819_v0 = vmax.f32 %v818_v57, 0.0  ;;  %1107 = vmatpush.msrb.mxu1 %v1098_v2  ;;  %1329 = vmatpush.msrb.mxu2 %v1098_v2  ;;  %v1091_v26 = vld [vmem:[#allocation30 + $0x30] sm:$0xff]  ;;  %v1090_v29 = vld [vmem:[#allocation30 + $0x28] sm:$0xff] }
 0x435   :  { %v840_v53 = vld [vmem:[#allocation2] sm:$0xff]  ;;  %782 = vst [vmem:[#allocation3] sm:$0x3] %v780_v42  ;;  %v823_v1 = vmax.f32 %v822_v60, 0.0  ;;  %v834_v3 = vmax.f32 %v833_v62, 0.0  ;;  %929 = vmatpush.msra.mxu3 %v920_v10  ;;  %v913_v28 = vld [vmem:[#allocation21 + $0x30] sm:$0xff] }
 0x436   :  { %882 = vmatmul.f32.vlgmr.msra.gmra.mxu2 %v840_v53  ;;  %790 = vst [vmem:[#allocation3] sm:$0x7c] %v789_v45  ;;  %1108 = vmatpush.msrb.mxu1 %v1097_v11  ;;  %v912_v30 = vld [vmem:[#allocation21 + $0x28] sm:$0xff]  ;;  %v1088_v32 = vld [vmem:[#allocation30 + $0x18] sm:$0xff]  ;;  %v1087_v36 = vld [vmem:[#allocation30 + $0x10] sm:$0xff] }
 0x437   :  { %v1023_v58 = vld [vmem:[#allocation3 + $0x8] sm:$0xff]  ;;  %800 = vst [vmem:[#allocation3] sm:$0x80] %v798_v48  ;;  %1330 = vmatpush.msrb.mxu2 %v1097_v11  ;;  %930 = vmatpush.msra.mxu3 %v919_v12  ;;  %v1086_v38 = vld [vmem:[#allocation30 + $0x8] sm:$0xff]  ;;  %v910_v39 = vld [vmem:[#allocation21 + $0x18] sm:$0xff] }
 0x438   :  { %1064 = vmatmul.f32.vlgmr.msra.gmra.mxu1 %v1023_v58  ;;  %794 = vst [vmem:[#allocation2 + $0x12] sm:$0x3f] %v793_v51  ;;  %v841_v4 = vld [vmem:[#allocation2 + $0x8] sm:$0xff]  ;;  %v1089_v31 = vld [vmem:[#allocation30 + $0x20] sm:$0xff]  ;;  %v1420_v44 = vld [vmem:[#allocation29] ss:$0 sm:$0xff] }
 0x439   :  { %801 = vst [vmem:[#allocation3 + $0x20] sm:$0xf] %v799_v54  ;;  %1109 = vmatpush.msrb.mxu1 %v1096_v13  ;;  %1331 = vmatpush.msrb.mxu2 %v1096_v13  ;;  %v911_v37 = vld [vmem:[#allocation21 + $0x20] sm:$0xff]  ;;  %v909_v41 = vld [vmem:[#allocation21 + $0x10] sm:$0xff]  ;;  %v908_v42 = vld [vmem:[#allocation21 + $0x8] sm:$0xff] }
 0x43a   :  { %811 = vst [vmem:[#allocation3 + $0x20] sm:$0xf0] %v809_v56  ;;  %931 = vmatpush.msra.mxu3 %v918_v15  ;;  %v1085_v40 = vld [vmem:[#allocation30] sm:$0xff]  ;;  %v2360_v47 = vld [vmem:[#allocation20] ss:$0 sm:$0xff]  ;;  %v978_v9 = vld [vmem:[#allocation24 + $0x50] sm:$0xff] }
 0x43b   :  { %805 = vst [vmem:[#allocation2 + $0x18] sm:$0x3f] %v804_v59  ;;  %1110 = vmatpush.msrb.mxu1 %v1095_v16  ;;  %1332 = vmatpush.msrb.mxu2 %v1095_v16  ;;  %v1027_v34 = vld [vmem:[#allocation3 + $0x18] sm:$0xff]  ;;  %v907_v43 = vld [vmem:[#allocation21] sm:$0xff] }
 0x43c   :  { %816 = vst [vmem:[#allocation2 + $0x1e] sm:$0x3f] %v815_v61  ;;  %932 = vmatpush.msra.mxu3 %v917_v18  ;;  %v983_v60 = vld [vmem:[#allocation24 + $0x78] sm:$0xff]  ;;  %v982_v61 = vld [vmem:[#allocation24 + $0x70] sm:$0xff]  ;;  %v980_v5 = vld [vmem:[#allocation24 + $0x60] sm:$0xff] }
 0x43d   :  { %812 = vst [vmem:[#allocation3 + $0x10] sm:$0x1] %v810_v63  ;;  %1111 = vmatpush.msrb.mxu1 %v1094_v19  ;;  %1333 = vmatpush.msrb.mxu2 %v1094_v19  ;;  %v981_v63 = vld [vmem:[#allocation24 + $0x68] sm:$0xff]  ;;  %v975_v16 = vld [vmem:[#allocation24 + $0x38] sm:$0xff]  ;;  %v974_v19 = vld [vmem:[#allocation24 + $0x30] sm:$0xff] }
 0x43e   :  { %885 = vmatmul.f32.gmra.mxu2 %v841_v4  ;;  %820 = vst [vmem:[#allocation3 + $0x10] sm:$0x3e] %v819_v0  ;;  %v1024_v7 = vld [vmem:[#allocation3] sm:$0xff]  ;;  %933 = vmatpush.msra.mxu3 %v916_v20  ;;  %v2365_v0 = vld [vmem:[%s2467_s24 + $0x78] sm:$0xff]  ;;  %v977_v11 = vld [vmem:[#allocation24 + $0x48] sm:$0xff] }
 0x43f   :  { %824 = vst [vmem:[#allocation2 + $0x24] sm:$0x3f] %v823_v1  ;;  %v842_v14 = vld [vmem:[#allocation2 + $0x10] sm:$0xff]  ;;  %1112 = vmatpush.msrb.mxu1 %v1093_v21  ;;  %1334 = vmatpush.msrb.mxu2 %v1093_v21 }
 0x440   :  { %1067 = vmatmul.f32.gmra.mxu1 %v1024_v7  ;;  %835 = vst [vmem:[#allocation2 + $0x2a] sm:$0x3f] %v834_v3  ;;  %934 = vmatpush.msra.mxu3 %v915_v22  ;;  %v2369_v3 = vld [vmem:[%s2467_s24 + $0x70] sm:$0xff] }
 0x441   :  { %v1025_v17 = vld [vmem:[#allocation3 + $0x20] sm:$0xff]  ;;  %1113 = vmatpush.msrb.mxu1 %v1092_v23  ;;  %1335 = vmatpush.msrb.mxu2 %v1092_v23 }
 0x442   :  { %935 = vmatpush.msra.mxu3 %v914_v25  ;;  %988 = vmatpush.msra.mxu0 %v983_v60  ;;  %v979_v7 = vld [vmem:[#allocation24 + $0x58] sm:$0xff] }
 0x443   :  { %v843_v24 = vld [vmem:[#allocation2 + $0x18] sm:$0xff]  ;;  %1114 = vmatpush.msrb.mxu1 %v1091_v26  ;;  %1336 = vmatpush.msrb.mxu2 %v1091_v26 }
 0x444   :  { %936 = vmatpush.msra.mxu3 %v913_v28  ;;  %989 = vmatpush.msra.mxu0 %v982_v61  ;;  %v973_v28 = vld [vmem:[#allocation24 + $0x28] sm:$0xff] }
 0x445   :  { %v1026_v27 = vld [vmem:[#allocation3 + $0x10] sm:$0xff]  ;;  %1115 = vmatpush.msrb.mxu1 %v1090_v29  ;;  %1337 = vmatpush.msrb.mxu2 %v1090_v29 }
 0x446   :  { %888 = vmatmul.f32.gmra.mxu2 %v842_v14  ;;  %937 = vmatpush.msra.mxu3 %v912_v30  ;;  %v844_v33 = vld [vmem:[#allocation2 + $0x20] sm:$0xff] }
 0x447   :  { %1116 = vmatpush.msrb.mxu1 %v1089_v31  ;;  %1338 = vmatpush.msrb.mxu2 %v1089_v31  ;;  %v845_v35 = vld [vmem:[#allocation2 + $0x28] sm:$0xff]  ;;  %v976_v14 = vld [vmem:[#allocation24 + $0x40] sm:$0xff] }
 0x448   :  { %1070 = vmatmul.f32.gmra.mxu1 %v1025_v17  ;;  %938 = vmatpush.msra.mxu3 %v911_v37  ;;  %v1154_v29 = vld [vmem:[%s2467_s24 + $0x60] sm:$0xff]  ;;  %v1153_v31 = vld [vmem:[%s2467_s24 + $0x58] sm:$0xff] }
 0x449   :  { %1117 = vmatpush.msrb.mxu1 %v1088_v32  ;;  %1339 = vmatpush.msrb.mxu2 %v1088_v32  ;;  %v972_v30 = vld [vmem:[#allocation24 + $0x20] sm:$0xff]  ;;  %v971_v32 = vld [vmem:[#allocation24 + $0x18] sm:$0xff]  ;;  %v969_v37 = vld [vmem:[#allocation24 + $0x8] sm:$0xff] }
 0x44a   :  { %939 = vmatpush.msra.mxu3 %v910_v39  ;;  %990 = vmatpush.msra.mxu0 %v981_v63  ;;  %v968_v39 = vld [vmem:[#allocation24] sm:$0xff] }
 0x44b   :  { %1118 = vmatpush.msrb.mxu1 %v1087_v36  ;;  %1340 = vmatpush.msrb.mxu2 %v1087_v36  ;;  %v1150_v36 = vld [vmem:[%s2467_s24 + $0x40] sm:$0xff] }
 0x44c   :  { %940 = vmatpush.msra.mxu3 %v909_v41  ;;  %991 = vmatpush.msra.mxu0 %v980_v5  ;;  %v1147_v41 = vld [vmem:[%s2467_s24 + $0x28] sm:$0xff] }
 0x44d   :  { %1119 = vmatpush.msrb.mxu1 %v1086_v38  ;;  %1341 = vmatpush.msrb.mxu2 %v1086_v38  ;;  %v1149_v38 = vld [vmem:[%s2467_s24 + $0x38] sm:$0xff] }
 0x44e   :  { %891 = vmatmul.f32.gmra.mxu2 %v843_v24  ;;  %941 = vmatpush.msra.mxu3 %v908_v42  ;;  %v1146_v42 = vld [vmem:[%s2467_s24 + $0x20] sm:$0xff] }
 0x44f   :  { %1120 = vmatpush.msrb.mxu1 %v1085_v40  ;;  %1342 = vmatpush.msrb.mxu2 %v1085_v40  ;;  %v1148_v40 = vld [vmem:[%s2467_s24 + $0x30] sm:$0xff] }
 0x450   :  { %1073 = vmatmul.f32.gmra.mxu1 %v1026_v27  ;;  %942 = vmatpush.msra.mxu3 %v907_v43  ;;  %v1155_v27 = vld [vmem:[%s2467_s24 + $0x68] sm:$0xff]  ;;  %v1145_v43 = vld [vmem:[%s2467_s24 + $0x18] sm:$0xff] }
 0x451   :  { %992 = vmatpush.msra.mxu0 %v979_v7 }
 0x452   :  { %1343 = vmatpush.msrb.mxu3 %v2365_v0 }
 0x453   :  { %993 = vmatpush.msra.mxu0 %v978_v9 }
 0x454   :  { %1344 = vmatpush.msrb.mxu3 %v2369_v3 }
 0x455   :  { %994 = vmatpush.msra.mxu0 %v977_v11 }
 0x456   :  { %894 = vmatmul.f32.gmra.mxu2 %v844_v33  ;;  %1345 = vmatpush.msrb.mxu3 %v1155_v27  ;;  %v1152_v33 = vld [vmem:[%s2467_s24 + $0x50] sm:$0xff] }
 0x457   :  { %995 = vmatpush.msra.mxu0 %v976_v14 }
 0x458   :  { %1076 = vmatmul.f32.gmra.mxu1 %v1027_v34  ;;  %1346 = vmatpush.msrb.mxu3 %v1154_v29  ;;  %v1151_v34 = vld [vmem:[%s2467_s24 + $0x48] sm:$0xff] }
 0x459   :  { %996 = vmatpush.msra.mxu0 %v975_v16 }
 0x45a   :  { %1347 = vmatpush.msrb.mxu3 %v1153_v31 }
 0x45b   :  { %997 = vmatpush.msra.mxu0 %v974_v19 }
 0x45c   :  { %1348 = vmatpush.msrb.mxu3 %v1152_v33 }
 0x45d   :  { %998 = vmatpush.msra.mxu0 %v973_v28 }
 0x45e   :  { %897 = vmatmul.f32.gmra.mxu2 %v845_v35  ;;  %v970_v35 = vld [vmem:[#allocation24 + $0x10] sm:$0xff]  ;;  %1349 = vmatpush.msrb.mxu3 %v1151_v34 }
 0x45f   :  { %999 = vmatpush.msra.mxu0 %v972_v30 }
 0x460   :  { %1350 = vmatpush.msrb.mxu3 %v1150_v36 }
 0x461   :  { %1000 = vmatpush.msra.mxu0 %v971_v32 }
 0x462   :  { %1351 = vmatpush.msrb.mxu3 %v1149_v38 }
 0x463   :  { %1001 = vmatpush.msra.mxu0 %v970_v35 }
 0x464   :  { %1352 = vmatpush.msrb.mxu3 %v1148_v40 }
 0x465   :  { %1002 = vmatpush.msra.mxu0 %v969_v37 }
 0x466   :  { %1353 = vmatpush.msrb.mxu3 %v1147_v41 }
 0x467   :  { %1003 = vmatpush.msra.mxu0 %v968_v39 }
 0x468   :  { %1354 = vmatpush.msrb.mxu3 %v1146_v42 }
 0x469   :  { %1162 = vmatpush.msrb.mxu0 %v2365_v0 }
 0x46a   :  { %1355 = vmatpush.msrb.mxu3 %v1145_v43 }
 0x46b   :  { %1163 = vmatpush.msrb.mxu0 %v2369_v3 }
 0x46d   :  { %1164 = vmatpush.msrb.mxu0 %v1155_v27 }
 0x46f   :  { %1165 = vmatpush.msrb.mxu0 %v1154_v29 }
 0x471   :  { %1166 = vmatpush.msrb.mxu0 %v1153_v31 }
 0x473   :  { %1167 = vmatpush.msrb.mxu0 %v1152_v33 }
 0x475   :  { %1168 = vmatpush.msrb.mxu0 %v1151_v34 }
 0x477   :  { %1169 = vmatpush.msrb.mxu0 %v1150_v36 }
 0x479   :  { %1170 = vmatpush.msrb.mxu0 %v1149_v38 }
 0x47b   :  { %1171 = vmatpush.msrb.mxu0 %v1148_v40 }
 0x47d   :  { %1172 = vmatpush.msrb.mxu0 %v1147_v41 }
 0x47f   :  { %1173 = vmatpush.msrb.mxu0 %v1146_v42 }
 0x481   :  { %1174 = vmatpush.msrb.mxu0 %v1145_v43 }
 0x4b5   :  { %v1065_v45 = vpop.f32.mrf.mxu1 }
 0x4b6   :  { %v1066_v46 = vadd.f32 %v1420_v44, %v1065_v45  ;;  %v1143_v45 = vld [vmem:[%s2467_s24 + $0x8] sm:$0xff] }
 0x4b8   :  { %v1080_v48 = vmax.f32 %v1066_v46, 0.0  ;;  %v1142_v46 = vld [vmem:[%s2467_s24] sm:$0xff] }
 0x4b9   :  { %v883_v49 = vpop.f32.mrf.mxu2 }
 0x4ba   :  { %1121 = vmatmul.f32.vlgmr.msrb.gmra.mxu1 %v1080_v48  ;;  %v884_v50 = vadd.f32 %v2360_v47, %v883_v49 }
 0x4bc   :  { %v901_v51 = vmax.f32 %v884_v50, 0.0 }
 0x4bd   :  { %v1068_v52 = vpop.f32.mrf.mxu1 }
 0x4be   :  { %v1069_v53 = vadd.f32 %v1420_v44, %v1068_v52  ;;  %943 = vmatmul.f32.vlgmr.msra.gmra.mxu3 %v901_v51 }
 0x4c0   :  { %v1081_v54 = vmax.f32 %v1069_v53, 0.0  ;;  %v1422_v53 = vld [vmem:[#allocation32] ss:$0 sm:$0xff] }
 0x4c1   :  { %v886_v55 = vpop.f32.mrf.mxu2 }
 0x4c2   :  { %1124 = vmatmul.f32.gmra.mxu1 %v1081_v54  ;;  %v887_v56 = vadd.f32 %v2360_v47, %v886_v55 }
 0x4c4   :  { %v902_v57 = vmax.f32 %v887_v56, 0.0 }
 0x4c5   :  { %v1071_v58 = vpop.f32.mrf.mxu1 }
 0x4c6   :  { %v1072_v59 = vadd.f32 %v1420_v44, %v1071_v58  ;;  %946 = vmatmul.f32.gmra.mxu3 %v902_v57 }
 0x4c8   :  { %v1082_v62 = vmax.f32 %v1072_v59, 0.0 }
 0x4c9   :  { %v889_v1 = vpop.f32.mrf.mxu2 }
 0x4ca   :  { %1127 = vmatmul.f32.vlgmr.msrb.gmra.mxu2 %v1082_v62  ;;  %v890_v4 = vadd.f32 %v2360_v47, %v889_v1 }
 0x4cc   :  { %v903_v6 = vmax.f32 %v890_v4, 0.0 }
 0x4cd   :  { %v1074_v8 = vpop.f32.mrf.mxu1 }
 0x4ce   :  { %v1075_v2 = vadd.f32 %v1420_v44, %v1074_v8  ;;  %949 = vmatmul.f32.gmra.mxu3 %v903_v6 }
 0x4d0   :  { %v1083_v10 = vmax.f32 %v1075_v2, 0.0 }
 0x4d1   :  { %v892_v12 = vpop.f32.mrf.mxu2 }
 0x4d2   :  { %1130 = vmatmul.f32.gmra.mxu2 %v1083_v10  ;;  %v893_v13 = vadd.f32 %v2360_v47, %v892_v12 }
 0x4d4   :  { %v904_v15 = vmax.f32 %v893_v13, 0.0 }
 0x4d5   :  { %v1077_v17 = vpop.f32.mrf.mxu1 }
 0x4d6   :  { %v1078_v18 = vadd.f32 %v1420_v44, %v1077_v17  ;;  %952 = vmatmul.f32.gmra.mxu3 %v904_v15  ;;  %v1144_v44 = vld [vmem:[%s2467_s24 + $0x10] sm:$0xff] }
 0x4d7   :  { %1356 = vmatpush.msrb.mxu3 %v1144_v44  ;;  %1175 = vmatpush.msrb.mxu0 %v1144_v44 }
 0x4d8   :  { %v1084_v20 = vmax.f32 %v1078_v18, 0.0  ;;  %v1424_v18 = vld [vmem:[#allocation26] ss:$0 sm:$0xff] }
 0x4d9   :  { %v895_v21 = vpop.f32.mrf.mxu2  ;;  %1357 = vmatpush.msrb.mxu3 %v1143_v45  ;;  %1176 = vmatpush.msrb.mxu0 %v1143_v45 }
 0x4da   :  { %1133 = vmatmul.f32.gmra.mxu2 %v1084_v20  ;;  %v896_v22 = vadd.f32 %v2360_v47, %v895_v21 }
 0x4db   :  { %1358 = vmatpush.msrb.mxu3 %v1142_v46  ;;  %1177 = vmatpush.msrb.mxu0 %v1142_v46 }
 0x4dc   :  { %v905_v23 = vmax.f32 %v896_v22, 0.0 }
 0x4de   :  { %955 = vmatmul.f32.gmra.mxu3 %v905_v23  ;;  %v1425_v23 = vld [vmem:[#allocation33] ss:$0 sm:$0xff] }
 0x4e1   :  { %v898_v24 = vpop.f32.mrf.mxu2 }
 0x4e2   :  { %v899_v25 = vadd.f32 %v2360_v47, %v898_v24  ;;  %v1423_v47 = vld [vmem:[#allocation23] ss:$0 sm:$0xff] }
 0x4e4   :  { %v906_v26 = vmax.f32 %v899_v25, 0.0 }
 0x4e6   :  { %958 = vmatmul.f32.gmra.mxu3 %v906_v26 }
 0x537   :  { %v1122_v11 = vpop.f32.mrf.mxu1 }
 0x538   :  { %v1123_v13 = vadd.f32 %v1422_v53, %v1122_v11 }
 0x53a   :  { %v1137_v14 = vmax.f32 %v1123_v13, 0.0 }
 0x53f   :  { %v1125_v15 = vpop.f32.mrf.mxu1 }
 0x540   :  { %v1126_v16 = vadd.f32 %v1422_v53, %v1125_v15 }
 0x541   :  { %v944_v48 = vpop.f32.mrf.mxu3 }
 0x542   :  { %v945_v49 = vadd.f32 %v1423_v47, %v944_v48  ;;  %v1138_v17 = vmax.f32 %v1126_v16, 0.0 }
 0x544   :  { %v962_v50 = vmax.f32 %v945_v49, 0.0 }
 0x546   :  { %1004 = vmatmul.f32.vlgmr.msra.gmra.mxu0 %v962_v50 }
 0x549   :  { %v947_v51 = vpop.f32.mrf.mxu3 }
 0x54a   :  { %v948_v52 = vadd.f32 %v1423_v47, %v947_v51 }
 0x54c   :  { %v963_v54 = vmax.f32 %v948_v52, 0.0 }
 0x54d   :  { %v1128_v55 = vpop.f32.mrf.mxu2 }
 0x54e   :  { %v1129_v56 = vadd.f32 %v1422_v53, %v1128_v55  ;;  %1007 = vmatmul.f32.gmra.mxu0 %v963_v54 }
 0x550   :  { %v1139_v57 = vmax.f32 %v1129_v56, 0.0 }
 0x551   :  { %v950_v58 = vpop.f32.mrf.mxu3 }
 0x552   :  { %1184 = vmatmul.f32.vlgmr.msrb.gmra.mxu3 %v1139_v57  ;;  %v951_v59 = vadd.f32 %v1423_v47, %v950_v58 }
 0x554   :  { %v964_v60 = vmax.f32 %v951_v59, 0.0 }
 0x555   :  { %v1131_v61 = vpop.f32.mrf.mxu2 }
 0x556   :  { %v1132_v62 = vadd.f32 %v1422_v53, %v1131_v61  ;;  %1010 = vmatmul.f32.gmra.mxu0 %v964_v60 }
 0x558   :  { %v1140_v63 = vmax.f32 %v1132_v62, 0.0 }
 0x559   :  { %v953_v0 = vpop.f32.mrf.mxu3 }
 0x55a   :  { %1187 = vmatmul.f32.gmra.mxu3 %v1140_v63  ;;  %v954_v1 = vadd.f32 %v1423_v47, %v953_v0 }
 0x55c   :  { %v965_v3 = vmax.f32 %v954_v1, 0.0 }
 0x55d   :  { %v1134_v4 = vpop.f32.mrf.mxu2 }
 0x55e   :  { %v1135_v5 = vadd.f32 %v1422_v53, %v1134_v4  ;;  %1013 = vmatmul.f32.gmra.mxu0 %v965_v3 }
 0x560   :  { %v1141_v6 = vmax.f32 %v1135_v5, 0.0 }
 0x561   :  { %v956_v7 = vpop.f32.mrf.mxu3 }
 0x562   :  { %1190 = vmatmul.f32.gmra.mxu3 %v1141_v6  ;;  %v957_v8 = vadd.f32 %v1423_v47, %v956_v7 }
 0x564   :  { %v966_v2 = vmax.f32 %v957_v8, 0.0 }
 0x566   :  { %1016 = vmatmul.f32.gmra.mxu0 %v966_v2 }
 0x569   :  { %v959_v9 = vpop.f32.mrf.mxu3 }
 0x56a   :  { %v960_v10 = vadd.f32 %v1423_v47, %v959_v9 }
 0x56c   :  { %v967_v12 = vmax.f32 %v960_v10, 0.0 }
 0x56e   :  { %1019 = vmatmul.f32.gmra.mxu0 %v967_v12 }
 0x576   :  { %1178 = vmatmul.f32.vlgmr.msrb.gmra.mxu0 %v1137_v14 }
 0x57e   :  { %1181 = vmatmul.f32.gmra.mxu0 %v1138_v17 }
 0x5c3   :  { %v1005_v19 = vpop.f32.mrf.mxu0 }
 0x5c4   :  { %v1006_v20 = vadd.f32 %v1424_v18, %v1005_v19 }
 0x5c6   :  { %1195 = vst.msk [vmem:[%s2168_s4] sm:$0x3f] %vm1194_vm8, %v1006_v20 }
 0x5c7   :  { %1305 = vst.msk [vmem:[%s2168_s4 + $0xa] sm:$0xc0] %vm1199_vm9, %v1006_v20 }
 0x5cb   :  { %v1008_v21 = vpop.f32.mrf.mxu0 }
 0x5cc   :  { %v1009_v22 = vadd.f32 %v1424_v18, %v1008_v21 }
 0x5ce   :  { %1306 = vst.msk [vmem:[%s2168_s4 + $0x12] sm:$0xf] %vm1201_vm10, %v1009_v22 }
 0x5cf   :  { %1309 = vst.msk [vmem:[%s2168_s4 + $0x1c] sm:$0xf0] %vm1208_vm11, %v1009_v22 }
 0x5d3   :  { %v1011_v24 = vpop.f32.mrf.mxu0 }
 0x5d4   :  { %v1012_v25 = vadd.f32 %v1424_v18, %v1011_v24 }
 0x5d5   :  { %v1185_v26 = vpop.f32.mrf.mxu3 }
 0x5d6   :  { %1310 = vst.msk [vmem:[%s2168_s4 + $0x24] sm:$0x3] %vm1205_vm12, %v1012_v25  ;;  %v1186_v27 = vadd.f32 %v1425_v23, %v1185_v26 }
 0x5d7   :  { %1312 = vst.msk [vmem:[%s2168_s4 + $0x2e] sm:$0xfc] %vm1214_vm13, %v1012_v25 }
 0x5d8   :  { %1314 = vst.msk [vmem:[%s2168_s4 + $0x37] sm:$0xf] %vm1201_vm10, %v1186_v27 }
 0x5d9   :  { %1316 = vst.msk [vmem:[%s2168_s4 + $0x42] sm:$0xf0] %vm1208_vm11, %v1186_v27 }
 0x5db   :  { %v1014_v28 = vpop.f32.mrf.mxu0 }
 0x5dc   :  { %v1015_v29 = vadd.f32 %v1424_v18, %v1014_v28 }
 0x5dd   :  { %v1188_v30 = vpop.f32.mrf.mxu3 }
 0x5de   :  { %1315 = vst.msk [vmem:[%s2168_s4 + $0x40] sm:$0x3f] %vm1194_vm8, %v1015_v29  ;;  %v1189_v31 = vadd.f32 %v1425_v23, %v1188_v30 }
 0x5df   :  { %1318 = vst.msk [vmem:[%s2168_s4 + $0x4a] sm:$0xc0] %vm1199_vm9, %v1015_v29 }
 0x5e0   :  { %1317 = vst.msk [vmem:[%s2168_s4 + $0x4a] sm:$0x1] %vm1222_vm14, %v1189_v31 }
 0x5e1   :  { %1320 = vst.msk [vmem:[%s2168_s4 + $0x55] sm:$0x3e] %vm1227_vm15, %v1189_v31 }
 0x5e2   :  { %1323 = vst.msk [vmem:[%s2168_s4 + $0x60] sm:$0xc0] %vm1199_vm9, %v1189_v31 }
 0x5e3   :  { %v1017_v32 = vpop.f32.mrf.mxu0 }
 0x5e4   :  { %v1018_v33 = vadd.f32 %v1424_v18, %v1017_v32 }
 0x5e5   :  { %v1191_v34 = vpop.f32.mrf.mxu3 }
 0x5e6   :  { %1319 = vst.msk [vmem:[%s2168_s4 + $0x52] sm:$0xf] %vm1201_vm10, %v1018_v33  ;;  %v1192_v35 = vadd.f32 %v1425_v23, %v1191_v34 }
 0x5e7   :  { %1321 = vst.msk [vmem:[%s2168_s4 + $0x5c] sm:$0xf0] %vm1208_vm11, %v1018_v33 }
 0x5e8   :  { %1324 = vst.msk [vmem:[%s2168_s4 + $0x68] sm:$0x7] %vm1233_vm0, %v1192_v35 }
 0x5e9   :  { %1326 = vst.msk [vmem:[%s2168_s4 + $0x73] sm:$0xf8] %vm1237_vm1, %v1192_v35 }
 0x5eb   :  { %v1020_v36 = vpop.f32.mrf.mxu0 }
 0x5ec   :  { %v1021_v37 = vadd.f32 %v1424_v18, %v1020_v36 }
 0x5ee   :  { %1322 = vst.msk [vmem:[%s2168_s4 + $0x64] sm:$0x3] %vm1205_vm12, %v1021_v37 }
 0x5ef   :  { %1325 = vst.msk [vmem:[%s2168_s4 + $0x6e] sm:$0xfc] %vm1214_vm13, %v1021_v37 }
 0x5f3   :  { %v1179_v38 = vpop.f32.mrf.mxu0 }
 0x5f4   :  { %v1180_v39 = vadd.f32 %v1425_v23, %v1179_v38 }
 0x5f6   :  { %1197 = vst.msk [vmem:[%s2168_s4 + $0x6] sm:$0x1f] %vm1196_vm2, %v1180_v39 }
 0x5f7   :  { %1307 = vst.msk [vmem:[%s2168_s4 + $0x11] sm:$0xe0] %vm1203_vm3, %v1180_v39 }
 0x5fb   :  { %v1182_v40 = vpop.f32.mrf.mxu0 }
 0x5fc   :  { %v1183_v41 = vadd.f32 %v1425_v23, %v1182_v40 }
 0x5fe   :  { %1308 = vst.msk [vmem:[%s2168_s4 + $0x19] sm:$0x3] %vm1205_vm12, %v1183_v41 }
 0x5ff   :  { %1311 = vst.msk [vmem:[%s2168_s4 + $0x24] sm:$0x7c] %vm1211_vm4, %v1183_v41 }
 0x600   :  { %1313 = vst.msk [vmem:[%s2168_s4 + $0x2f] sm:$0x80] %vm1216_vm5, %v1183_v41 }
 0x601   :  { %1247 = vsyncpa [#allocation5], 1 }
 0x602   :  { %1248 = vsyncpa [#allocation7], 1 }
 0x603   :  { %1249 = vsyncpa [#allocation10], 1 }
 0x604   :  { %1250 = vsyncpa [#allocation13], 1 }
 0x605   :  { %1251 = vsyncpa [#allocation16], 1 }
 0x606   :  { %1252 = vsyncpa [#allocation19], 1 }
 0x607   :  { %1253 = vsyncpa [#allocation22], 1 }
 0x608   :  { %1254 = vsyncpa [#allocation25], 1 }
 0x609   :  { %1255 = vsyncpa [#allocation28], 1 }
 0x60a   :  { %1256 = vsyncpa [#allocation31], 1 }
 0x60b   :  { %1257 = vsyncpa [#allocation34], 1 }

</bundles_post_ra>
